<compile_context>
chip_gen: v7x
topology: tpu7x:2x2x1
jax: 0.10.0
libtpu: 0.0.40
codegen_flags: <defaults>
</compile_context>

<pallas_src>
import functools

import numpy as np
import jax
import jax.numpy as jnp
from jax import lax
from jax.experimental import pallas as pl
from jax.experimental.pallas import tpu as pltpu

_NEG = -1e30  # finite "-inf" sentinel (avoids inf-inf -> nan in the online max update)


def _round_up(x, m):
    return ((x + m - 1) // m) * m


def gat_kernel(row_ref, col_ref, h_ref, wg_ref, wa2_ref, out_ref,
               g_ref, wh2_ref, acc_ref, m_ref,
               *, alpha, concat, fout, onehot_dtype):
    k = pl.program_id(0)
    nk = pl.num_programs(0)
    neg = jnp.float32(_NEG)

    # ---------------- one-time node-side work (grid step 0) ----------------
    @pl.when(k == 0)
    def _init():
        # G = [Wh | Wh1 | 1]  (N_pad, Fout+2): ONE fused MXU matmul.
        g = jnp.dot(h_ref[...], wg_ref[...], preferred_element_type=jnp.float32)
        g_ref[...] = g.astype(g_ref.dtype)
        # Wh2 as a lane-dense (1, N_pad) row: contract the feature dims of both sides.
        wh2_ref[...] = lax.dot_general(
            wa2_ref[...], h_ref[...], (((1,), (1,)), ((), ())),
            preferred_element_type=jnp.float32)
        acc_ref[...] = jnp.zeros_like(acc_ref)
        m_ref[...] = jnp.full_like(m_ref, neg)

    # ---------------- per-edge-tile work ----------------
    row_t = row_ref[...]                                    # (Et, 1) int32
    col_t = col_ref[...]                                    # (Et, 1) int32
    et = row_t.shape[0]
    n_pad = m_ref.shape[1]
    iota = lax.broadcasted_iota(jnp.int32, (et, n_pad), 1)
    rm = row_t == iota                                      # (Et, N_pad) source one-hot
    cm = col_t == iota                                      # (Et, N_pad) dest   one-hot

    # fused gather: S = R @ [Wh | Wh1 | 1]  (Wh1 and the "ones" column ride along)
    s = jnp.dot(rm.astype(onehot_dtype), g_ref[...],
                preferred_element_type=jnp.float32)         # (Et, Fout+2) f32
    wh1_e = s[:, fout:fout + 1]                             # (Et, 1) = Wh1[row]

    # edge logits broadcast into the (edge, node) slab used for the segment max
    logit = wh1_e + wh2_ref[...]                            # (Et, N_pad)
    logit = jnp.where(logit > 0, logit, jnp.float32(alpha) * logit)   # LeakyReLU
    e_m = jnp.where(cm, logit, neg)

    # online segment softmax (flash style); node statistics are lane-dense (1, N_pad)
    m_old = m_ref[...]
    m_new = jnp.maximum(m_old, jnp.max(e_m, axis=0, keepdims=True))
    scale = jnp.exp(m_old - m_new)                          # (1, N_pad), <= 1

    e_edge = jnp.max(e_m, axis=1, keepdims=True)            # (Et, 1): the single unmasked lane
    max_e = jnp.max(jnp.where(cm, m_new, neg), axis=1, keepdims=True)  # m_new[col]
    exp_e = jnp.exp(e_edge - max_e)                         # (Et, 1): exp only per edge

    # node-side normalization: scatter [Wh_src | Wh1_src | 1] * exp_e in ONE matmul;
    # accumulator row `fout+1` is the softmax denominator, rows [0:fout] the numerator.
    sw = s * exp_e                                          # (Et, Fout+2)
    contrib = lax.dot_general(sw.astype(onehot_dtype), cm.astype(onehot_dtype),
                              (((0,), (0,)), ((), ())),
                              preferred_element_type=jnp.float32)      # (Fout+2, N_pad)
    acc_ref[...] = acc_ref[...] * scale + contrib
    m_ref[...] = m_new

    # ---------------- finalize (last grid step) ----------------
    @pl.when(k == nk - 1)
    def _finalize():
        denom = acc_ref[fout + 1:fout + 2, :] + jnp.float32(1e-16)     # (1, N_pad)
        hp = acc_ref[:fout, :] / denom                                 # (Fout, N_pad)
        if concat:
            # ELU; clamp the exp argument so the unselected branch cannot overflow.
            hp = jnp.where(hp > 0, hp, jnp.exp(jnp.minimum(hp, 0.0)) - 1.0)
        out_ref[...] = hp.astype(out_ref.dtype)


def preprocess_edges(adj, *, edge_tile=128):
    """One-time host-side edge preprocessing (keep out of the per-step hot path).

    Mirrors the PyTorch forward: appends a (u, u) edge for every unique destination,
    then pads the edge count to a fixed multiple of `edge_tile` with sentinel -1
    (matches no node in the one-hot construction) so shapes stay stable.
    """
    # TODO(synk): torch.unique / edge-list extension has a dynamic output size and no
    # clean in-kernel Pallas equivalent; it is done once on the host with numpy.
    adj_np = np.asarray(adj)
    row = adj_np[0].astype(np.int32)
    col = adj_np[1].astype(np.int32)
    uniq = np.unique(col).astype(np.int32)
    row_ext = np.concatenate([row, uniq])
    col_ext = np.concatenate([col, uniq])
    e = row_ext.shape[0]
    ep = _round_up(max(e, 1), edge_tile)
    pad = ep - e
    row_p = np.concatenate([row_ext, np.full((pad,), -1, np.int32)]).reshape(ep, 1)
    col_p = np.concatenate([col_ext, np.full((pad,), -1, np.int32)]).reshape(ep, 1)
    return jnp.asarray(row_p), jnp.asarray(col_p)


def gat_forward_padded(h, row_p, col_p, W, a, *, alpha=0.2, concat=True,
                       edge_tile=128, onehot_dtype=jnp.float32):
    """Hot path: edge list already extended + padded (shape-stable, jittable)."""
    h = jnp.asarray(h, jnp.float32)
    W = jnp.asarray(W, jnp.float32)
    a = jnp.asarray(a, jnp.float32)
    N, Fin = h.shape
    Fout = W.shape[1]
    n_pad = _round_up(N, 128)          # lane-dense node axis (full MXU columns)
    fa = Fin + 1                       # h augmented with a ones column
    fg = Fout + 2                      # [Wh | Wh1 | 1]
    ep = row_p.shape[0]
    et = int(edge_tile)
    assert et % 8 == 0 and ep % et == 0, "edges must be padded to a multiple of edge_tile"
    nk = ep // et
    # Per-tile VMEM ~ a few (et, n_pad) slabs; size `edge_tile` per generation
    # (v7x has 64 MiB VMEM -> ~half the tile of v5e/v6e for large n_pad).

    # Fused parameters: Wg = [[W, W@a1, 0], [0, 0, 1]],  wa2 = [(W@a2)^T | 0].
    wa1 = (W @ a[:Fout]).reshape(-1)
    wa2 = (W @ a[Fout:]).reshape(-1)
    wg = jnp.zeros((fa, fg), jnp.float32)
    wg = wg.at[:Fin, :Fout].set(W)
    wg = wg.at[:Fin, Fout].set(wa1)
    wg = wg.at[Fin, Fout + 1].set(1.0)
    wa2_row = jnp.zeros((1, fa), jnp.float32).at[0, :Fin].set(wa2)
    h_aug = jnp.zeros((n_pad, fa), jnp.float32)
    h_aug = h_aug.at[:N, :Fin].set(h)
    h_aug = h_aug.at[:, Fin].set(1.0)

    kernel = functools.partial(gat_kernel, alpha=float(alpha), concat=bool(concat),
                               fout=int(Fout), onehot_dtype=onehot_dtype)

    cost = pl.CostEstimate(
        flops=int(2 * n_pad * fa * fg + 2 * n_pad * fa + nk * 4 * et * n_pad * fg),
        transcendentals=int(nk * (et + n_pad)),
        bytes_accessed=int(4 * (2 * ep + n_pad * fa + fa * fg + fa + Fout * n_pad)),
    )

    out = pl.pallas_call(
        kernel,
        out_shape=jax.ShapeDtypeStruct((Fout, n_pad), jnp.float32),
        grid_spec=pltpu.PrefetchScalarGridSpec(
            num_scalar_prefetch=0,
            grid=(nk,),
            in_specs=[
                pl.BlockSpec((et, 1), lambda k: (k, 0)),       # row tile
                pl.BlockSpec((et, 1), lambda k: (k, 0)),       # col tile
                pl.BlockSpec((n_pad, fa), lambda k: (0, 0)),   # [h | 1]        (resident)
                pl.BlockSpec((fa, fg), lambda k: (0, 0)),      # fused W slab   (resident)
                pl.BlockSpec((1, fa), lambda k: (0, 0)),       # fused (W@a2)^T (resident)
            ],
            out_specs=pl.BlockSpec((Fout, n_pad), lambda k: (0, 0)),
            scratch_shapes=[
                pltpu.VMEM((n_pad, fg), onehot_dtype),         # G = [Wh | Wh1 | 1]
                pltpu.VMEM((1, n_pad), jnp.float32),           # Wh2 row
                pltpu.VMEM((fg, n_pad), jnp.float32),          # accumulator (num | . | denom)
                pltpu.VMEM((1, n_pad), jnp.float32),           # running segment max
            ],
        ),
        compiler_params=pltpu.CompilerParams(
            dimension_semantics=("arbitrary",),                # edge axis carries the accumulator
            vmem_limit_bytes=32 * 1024 * 1024,
        ),
        cost_estimate=cost,
    )(row_p, col_p, h_aug, wg, wa2_row)

    # lane-dense (Fout, N_pad) slab -> (N, Fout): pure layout plumbing in the wrapper.
    return out[:, :N].T


def gat_forward(h, adj, W, a, *, alpha=0.2, concat=True, edge_tile=128,
                onehot_dtype=jnp.float32):
    """Convenience wrapper: host preprocessing + Pallas forward."""
    row_p, col_p = preprocess_edges(adj, edge_tile=edge_tile)
    return gat_forward_padded(h, row_p, col_p, W, a, alpha=alpha, concat=concat,
                              edge_tile=edge_tile, onehot_dtype=onehot_dtype)


def gat_reference_numpy(h, adj, W, a, *, alpha=0.2, concat=True):
    h = np.asarray(h, np.float64)
    W = np.asarray(W, np.float64)
    a = np.asarray(a, np.float64)
    row = np.asarray(adj[0]).astype(np.int64)
    col = np.asarray(adj[1]).astype(np.int64)
    uniq = np.unique(col)
    row = np.concatenate([row, uniq])
    col = np.concatenate([col, uniq])
    N = h.shape[0]
    Fout = W.shape[1]
    Wh = h @ W
    Wh1 = Wh @ a[:Fout]
    Wh2 = Wh @ a[Fout:]
    e = (Wh2[col] + Wh1[row]).reshape(-1)
    e = np.where(e > 0, e, alpha * e)
    seg_max = np.full((N,), -np.inf)
    np.maximum.at(seg_max, col, e)
    ex = np.exp(e - seg_max[col])
    seg_sum = np.zeros((N,))
    np.add.at(seg_sum, col, ex)
    att = ex / (seg_sum[col] + 1e-16)
    msg = Wh[row] * att[:, None]
    hp = np.zeros((N, Fout))
    np.add.at(hp, col, msg)
    if concat:
        hp = np.where(hp > 0, hp, np.exp(hp) - 1.0)
    return hp


if __name__ == "__main__":
    N, Fin, Fout, E = 16, 8, 16, 200   # E > edge_tile so the online-softmax path streams 2 tiles
    alpha = 0.2

    key = jax.random.PRNGKey(0)
    k_w, k_a, k_h, k_r, k_c = jax.random.split(key, 5)

    # xavier_uniform_(gain=1.414) style deterministic init
    gain = 1.414
    bW = gain * np.sqrt(6.0 / (Fin + Fout))
    W = jax.random.uniform(k_w, (Fin, Fout), minval=-bW, maxval=bW, dtype=jnp.float32)
    ba = gain * np.sqrt(6.0 / (2 * Fout + 1))
    a = jax.random.uniform(k_a, (2 * Fout, 1), minval=-ba, maxval=ba, dtype=jnp.float32)

    h = jax.random.normal(k_h, (N, Fin), dtype=jnp.float32)
    adj = jnp.stack([
        jax.random.randint(k_r, (E,), 0, N),
        jax.random.randint(k_c, (E,), 0, N),
    ]).astype(jnp.int32)

    out = gat_forward(h, adj, W, a, alpha=alpha, concat=True)
    out = jax.block_until_ready(out)

    ref = gat_reference_numpy(h, adj, W, a, alpha=alpha, concat=True)
    np.testing.assert_allclose(np.asarray(out), ref, rtol=1e-3, atol=1e-3)
    print("KERNEL_OK")
</pallas_src>

<mosaic_0001>
module attributes {stable_mosaic.version = 11 : i64} {
  func.func @gat_kernel(%arg0: i32, %arg1: memref<128x1xi32, #tpu.memory_space<vmem>>, %arg2: memref<128x1xi32, #tpu.memory_space<vmem>>, %arg3: memref<128x9xf32, #tpu.memory_space<vmem>>, %arg4: memref<9x18xf32, #tpu.memory_space<vmem>>, %arg5: memref<1x9xf32, #tpu.memory_space<vmem>>, %arg6: memref<16x128xf32, #tpu.memory_space<vmem>>, %arg7: memref<128x18xf32, #tpu.memory_space<vmem>>, %arg8: memref<1x128xf32, #tpu.memory_space<vmem>>, %arg9: memref<18x128xf32, #tpu.memory_space<vmem>>, %arg10: memref<1x128xf32, #tpu.memory_space<vmem>>) attributes {dimension_semantics = [#tpu.dimension_semantics<arbitrary>], iteration_bounds = array<i64: 2>, scalar_prefetch = 0 : i64, scratch_operands = 4 : i64, tpu.core_type = #tpu.core_type<tc>, window_params = [{transform_indices = @transform_0, window_bounds = array<i64: 128, 1>}, {transform_indices = @transform_1, window_bounds = array<i64: 128, 1>}, {pipeline_mode = #tpu.pipeline_mode<synchronous>, transform_indices = @transform_2, window_bounds = array<i64: 128, 9>}, {pipeline_mode = #tpu.pipeline_mode<synchronous>, transform_indices = @transform_3, window_bounds = array<i64: 9, 18>}, {pipeline_mode = #tpu.pipeline_mode<synchronous>, transform_indices = @transform_4, window_bounds = array<i64: 1, 9>}, {pipeline_mode = #tpu.pipeline_mode<synchronous>, transform_indices = @transform_5, window_bounds = array<i64: 16, 128>}]} {
    %c0_i32 = arith.constant 0 : i32
    %0 = arith.cmpi eq, %arg0, %c0_i32 : i32
    %1 = arith.extui %0 : i1 to i32
    %cst = arith.constant -1.000000e+30 : f32
    %c0_i32_0 = arith.constant 0 : i32
    %2 = arith.cmpi ne, %1, %c0_i32_0 : i32
    scf.if %2 {
      %c0_26 = arith.constant 0 : index
      %c0_27 = arith.constant 0 : index
      %56 = vector.load %arg3[%c0_26, %c0_27] : memref<128x9xf32, #tpu.memory_space<vmem>>, vector<128x9xf32>
      %c0_28 = arith.constant 0 : index
      %c0_29 = arith.constant 0 : index
      %57 = vector.load %arg4[%c0_28, %c0_29] : memref<9x18xf32, #tpu.memory_space<vmem>>, vector<9x18xf32>
      %cst_30 = arith.constant dense<0.000000e+00> : vector<128x18xf32>
      %58 = tpu.matmul %56, %57, %cst_30 {dimension_numbers = #tpu.dot_dimension_numbers<[1], [0], [0], [1], [0, 0, 1, 1], [], []>} : vector<128x9xf32>, vector<9x18xf32>, vector<128x18xf32> -> vector<128x18xf32>
      %c0_31 = arith.constant 0 : index
      %c0_32 = arith.constant 0 : index
      %59 = vector.load %arg7[%c0_31, %c0_32] : memref<128x18xf32, #tpu.memory_space<vmem>>, vector<128x18xf32>
      tpu.vector_store %arg7[%c0_31, %c0_32], %58 {strides = array<i32>} : memref<128x18xf32, #tpu.memory_space<vmem>>, vector<128x18xf32>,
      %c0_33 = arith.constant 0 : index
      %c0_34 = arith.constant 0 : index
      %60 = vector.load %arg5[%c0_33, %c0_34] : memref<1x9xf32, #tpu.memory_space<vmem>>, vector<1x9xf32>
      %c0_35 = arith.constant 0 : index
      %c0_36 = arith.constant 0 : index
      %61 = vector.load %arg3[%c0_35, %c0_36] : memref<128x9xf32, #tpu.memory_space<vmem>>, vector<128x9xf32>
      %cst_37 = arith.constant dense<0.000000e+00> : vector<1x128xf32>
      %62 = tpu.matmul %60, %61, %cst_37 {dimension_numbers = #tpu.dot_dimension_numbers<[1], [1], [0], [0], [0, 0, 1, 0], [], []>} : vector<1x9xf32>, vector<128x9xf32>, vector<1x128xf32> -> vector<1x128xf32>
      %c0_38 = arith.constant 0 : index
      %c0_39 = arith.constant 0 : index
      %63 = vector.load %arg8[%c0_38, %c0_39] : memref<1x128xf32, #tpu.memory_space<vmem>>, vector<1x128xf32>
      tpu.vector_store %arg8[%c0_38, %c0_39], %62 {strides = array<i32>} : memref<1x128xf32, #tpu.memory_space<vmem>>, vector<1x128xf32>,
      %cst_40 = arith.constant 0.000000e+00 : f32
      %64 = vector.broadcast %cst_40 : f32 to vector<18x128xf32>
      %c0_41 = arith.constant 0 : index
      %c0_42 = arith.constant 0 : index
      %65 = vector.load %arg9[%c0_41, %c0_42] : memref<18x128xf32, #tpu.memory_space<vmem>>, vector<18x128xf32>
      tpu.vector_store %arg9[%c0_41, %c0_42], %64 {strides = array<i32>} : memref<18x128xf32, #tpu.memory_space<vmem>>, vector<18x128xf32>,
      %66 = vector.broadcast %cst : f32 to vector<1x128xf32>
      %c0_43 = arith.constant 0 : index
      %c0_44 = arith.constant 0 : index
      %67 = vector.load %arg10[%c0_43, %c0_44] : memref<1x128xf32, #tpu.memory_space<vmem>>, vector<1x128xf32>
      tpu.vector_store %arg10[%c0_43, %c0_44], %66 {strides = array<i32>} : memref<1x128xf32, #tpu.memory_space<vmem>>, vector<1x128xf32>,
    } else {
    }
    %c0 = arith.constant 0 : index
    %c0_1 = arith.constant 0 : index
    %3 = vector.load %arg1[%c0, %c0_1] : memref<128x1xi32, #tpu.memory_space<vmem>>, vector<128x1xi32>
    %c0_2 = arith.constant 0 : index
    %c0_3 = arith.constant 0 : index
    %4 = vector.load %arg2[%c0_2, %c0_3] : memref<128x1xi32, #tpu.memory_space<vmem>>, vector<128x1xi32>
    %5 = tpu.iota {dimensions = array<i32: 1>} : vector<128x128xi32>
    %6 = vector.broadcast %3 : vector<128x1xi32> to vector<128x128xi32>
    %7 = arith.cmpi eq, %6, %5 : vector<128x128xi32>
    %8 = vector.broadcast %4 : vector<128x1xi32> to vector<128x128xi32>
    %9 = arith.cmpi eq, %8, %5 : vector<128x128xi32>
    %10 = arith.extui %7 : vector<128x128xi1> to vector<128x128xi32>
    %11 = arith.sitofp %10 : vector<128x128xi32> to vector<128x128xf32>
    %c0_4 = arith.constant 0 : index
    %c0_5 = arith.constant 0 : index
    %12 = vector.load %arg7[%c0_4, %c0_5] : memref<128x18xf32, #tpu.memory_space<vmem>>, vector<128x18xf32>
    %cst_6 = arith.constant dense<0.000000e+00> : vector<128x18xf32>
    %13 = tpu.matmul %11, %12, %cst_6 {dimension_numbers = #tpu.dot_dimension_numbers<[1], [0], [0], [1], [0, 0, 1, 1], [], []>} : vector<128x128xf32>, vector<128x18xf32>, vector<128x18xf32> -> vector<128x18xf32>
    %14 = vector.extract_strided_slice %13 {offsets = [0, 16], sizes = [128, 1], strides = [1, 1]} : vector<128x18xf32> to vector<128x1xf32>
    %c0_7 = arith.constant 0 : index
    %c0_8 = arith.constant 0 : index
    %15 = vector.load %arg8[%c0_7, %c0_8] : memref<1x128xf32, #tpu.memory_space<vmem>>, vector<1x128xf32>
    %16 = vector.broadcast %14 : vector<128x1xf32> to vector<128x128xf32>
    %17 = vector.broadcast %15 : vector<1x128xf32> to vector<128x128xf32>
    %18 = arith.addf %16, %17 : vector<128x128xf32>
    %cst_9 = arith.constant 0.000000e+00 : f32
    %19 = vector.broadcast %cst_9 : f32 to vector<128x128xf32>
    %20 = arith.cmpf ogt, %18, %19 : vector<128x128xf32>
    %cst_10 = arith.constant 2.000000e-01 : f32
    %21 = vector.broadcast %cst_10 : f32 to vector<128x128xf32>
    %22 = arith.mulf %21, %18 : vector<128x128xf32>
    %23 = arith.select %20, %18, %22 : vector<128x128xi1>, vector<128x128xf32>
    %cst_11 = arith.constant -1.000000e+30 : f32
    %24 = vector.broadcast %cst_11 : f32 to vector<128x128xf32>
    %25 = arith.select %9, %23, %24 : vector<128x128xi1>, vector<128x128xf32>
    %c0_12 = arith.constant 0 : index
    %c0_13 = arith.constant 0 : index
    %26 = vector.load %arg10[%c0_12, %c0_13] : memref<1x128xf32, #tpu.memory_space<vmem>>, vector<1x128xf32>
    %cst_14 = arith.constant dense<0xFF800000> : vector<128xf32>
    %27 = vector.multi_reduction <maximumf>, %25, %cst_14 [0] : vector<128x128xf32> to vector<128xf32>
    %28 = vector.shape_cast %27 : vector<128xf32> to vector<1x128xf32>
    %29 = arith.maximumf %26, %28 : vector<1x128xf32>
    %30 = arith.subf %26, %29 : vector<1x128xf32>
    %31 = math.exp %30 : vector<1x128xf32>
    %cst_15 = arith.constant dense<0xFF800000> : vector<128xf32>
    %32 = vector.multi_reduction <maximumf>, %25, %cst_15 [1] : vector<128x128xf32> to vector<128xf32>
    %33 = vector.shape_cast %32 : vector<128xf32> to vector<128x1xf32>
    %cst_16 = arith.constant -1.000000e+30 : f32
    %34 = vector.shape_cast %29 : vector<1x128xf32> to vector<1x128xf32>
    %35 = vector.broadcast %34 : vector<1x128xf32> to vector<128x128xf32>
    %36 = vector.broadcast %cst_16 : f32 to vector<128x128xf32>
    %37 = arith.select %9, %35, %36 : vector<128x128xi1>, vector<128x128xf32>
    %cst_17 = arith.constant dense<0xFF800000> : vector<128xf32>
    %38 = vector.multi_reduction <maximumf>, %37, %cst_17 [1] : vector<128x128xf32> to vector<128xf32>
    %39 = vector.shape_cast %38 : vector<128xf32> to vector<128x1xf32>
    %40 = arith.subf %33, %39 : vector<128x1xf32>
    %41 = math.exp %40 : vector<128x1xf32>
    %42 = vector.broadcast %41 : vector<128x1xf32> to vector<128x18xf32>
    %43 = arith.mulf %13, %42 : vector<128x18xf32>
    %44 = arith.extui %9 : vector<128x128xi1> to vector<128x128xi32>
    %45 = arith.sitofp %44 : vector<128x128xi32> to vector<128x128xf32>
    %cst_18 = arith.constant dense<0.000000e+00> : vector<18x128xf32>
    %46 = tpu.matmul %43, %45, %cst_18 {dimension_numbers = #tpu.dot_dimension_numbers<[0], [0], [1], [1], [0, 1, 1, 1], [], []>} : vector<128x18xf32>, vector<128x128xf32>, vector<18x128xf32> -> vector<18x128xf32>
    %c0_19 = arith.constant 0 : index
    %c0_20 = arith.constant 0 : index
    %47 = vector.load %arg9[%c0_19, %c0_20] : memref<18x128xf32, #tpu.memory_space<vmem>>, vector<18x128xf32>
    %48 = vector.broadcast %31 : vector<1x128xf32> to vector<18x128xf32>
    %49 = arith.mulf %47, %48 : vector<18x128xf32>
    %50 = arith.addf %49, %46 : vector<18x128xf32>
    %c0_21 = arith.constant 0 : index
    %c0_22 = arith.constant 0 : index
    %51 = vector.load %arg9[%c0_21, %c0_22] : memref<18x128xf32, #tpu.memory_space<vmem>>, vector<18x128xf32>
    tpu.vector_store %arg9[%c0_21, %c0_22], %50 {strides = array<i32>} : memref<18x128xf32, #tpu.memory_space<vmem>>, vector<18x128xf32>,
    %c0_23 = arith.constant 0 : index
    %c0_24 = arith.constant 0 : index
    %52 = vector.load %arg10[%c0_23, %c0_24] : memref<1x128xf32, #tpu.memory_space<vmem>>, vector<1x128xf32>
    tpu.vector_store %arg10[%c0_23, %c0_24], %29 {strides = array<i32>} : memref<1x128xf32, #tpu.memory_space<vmem>>, vector<1x128xf32>,
    %c1_i32 = arith.constant 1 : i32
    %53 = arith.cmpi eq, %arg0, %c1_i32 : i32
    %54 = arith.extui %53 : i1 to i32
    %c0_i32_25 = arith.constant 0 : i32
    %55 = arith.cmpi ne, %54, %c0_i32_25 : i32
    scf.if %55 {
      %c17 = arith.constant 17 : index
      %c0_26 = arith.constant 0 : index
      %56 = vector.load %arg9[%c17, %c0_26] : memref<18x128xf32, #tpu.memory_space<vmem>>, vector<1x128xf32>
      %cst_27 = arith.constant 1.000000e-16 : f32
      %57 = vector.broadcast %cst_27 : f32 to vector<1x128xf32>
      %58 = arith.addf %56, %57 : vector<1x128xf32>
      %c0_28 = arith.constant 0 : index
      %c0_29 = arith.constant 0 : index
      %59 = vector.load %arg9[%c0_28, %c0_29] : memref<18x128xf32, #tpu.memory_space<vmem>>, vector<16x128xf32>
      %60 = vector.broadcast %58 : vector<1x128xf32> to vector<16x128xf32>
      %61 = arith.divf %59, %60 : vector<16x128xf32>
      %cst_30 = arith.constant 0.000000e+00 : f32
      %62 = vector.broadcast %cst_30 : f32 to vector<16x128xf32>
      %63 = arith.cmpf ogt, %61, %62 : vector<16x128xf32>
      %cst_31 = arith.constant 0.000000e+00 : f32
      %64 = vector.broadcast %cst_31 : f32 to vector<16x128xf32>
      %65 = arith.minimumf %61, %64 : vector<16x128xf32>
      %66 = math.exp %65 : vector<16x128xf32>
      %cst_32 = arith.constant 1.000000e+00 : f32
      %67 = vector.broadcast %cst_32 : f32 to vector<16x128xf32>
      %68 = arith.subf %66, %67 : vector<16x128xf32>
      %69 = arith.select %63, %61, %68 : vector<16x128xi1>, vector<16x128xf32>
      %c0_33 = arith.constant 0 : index
      %c0_34 = arith.constant 0 : index
      %70 = vector.load %arg6[%c0_33, %c0_34] : memref<16x128xf32, #tpu.memory_space<vmem>>, vector<16x128xf32>
      tpu.vector_store %arg6[%c0_33, %c0_34], %69 {strides = array<i32>} : memref<16x128xf32, #tpu.memory_space<vmem>>, vector<16x128xf32>,
    } else {
    }
    return
  }
  func.func @transform_0(%arg0: i32) -> (i32, i32) {
    %c0_i32 = arith.constant 0 : i32
    %c0_i32_0 = arith.constant 0 : i32
    return %arg0, %c0_i32 : i32, i32
  }
  func.func @transform_1(%arg0: i32) -> (i32, i32) {
    %c0_i32 = arith.constant 0 : i32
    %c0_i32_0 = arith.constant 0 : i32
    return %arg0, %c0_i32 : i32, i32
  }
  func.func @transform_2(%arg0: i32) -> (i32, i32) {
    %c0_i32 = arith.constant 0 : i32
    %c0_i32_0 = arith.constant 0 : i32
    %c0_i32_1 = arith.constant 0 : i32
    return %c0_i32, %c0_i32_0 : i32, i32
  }
  func.func @transform_3(%arg0: i32) -> (i32, i32) {
    %c0_i32 = arith.constant 0 : i32
    %c0_i32_0 = arith.constant 0 : i32
    %c0_i32_1 = arith.constant 0 : i32
    return %c0_i32, %c0_i32_0 : i32, i32
  }
  func.func @transform_4(%arg0: i32) -> (i32, i32) {
    %c0_i32 = arith.constant 0 : i32
    %c0_i32_0 = arith.constant 0 : i32
    %c0_i32_1 = arith.constant 0 : i32
    return %c0_i32, %c0_i32_0 : i32, i32
  }
  func.func @transform_5(%arg0: i32) -> (i32, i32) {
    %c0_i32 = arith.constant 0 : i32
    %c0_i32_0 = arith.constant 0 : i32
    %c0_i32_1 = arith.constant 0 : i32
    return %c0_i32, %c0_i32_0 : i32, i32
  }
}

</mosaic_0001>

<bundles_post_ra>
// kernel: tpu_custom_call.1
= control target key start
LH: loop header
LB: loop body
LE: loop exit
PB: predicated region body
PF: predicated region fallthrough
CT: control target
= control target key end

     0   :  { %10 = vsyncpa [#allocation7], 0  ;;  %s2179_s18 = smov 0   ;;  %s2758_s0 = inlined_call_operand.vmem [shape: s32[256,1], index: 0, kind: input, shape index: {}]   ;;  %s2759_s1 = inlined_call_operand.vmem [shape: s32[256,1], index: 1, kind: input, shape index: {}]   ;;  %s2760_s2 = inlined_call_operand.vmem [shape: f32[128,9], index: 2, kind: input, shape index: {}]   ;;  %s2761_s3 = inlined_call_operand.vmem [shape: f32[9,18], index: 3, kind: input, shape index: {}]   ;;  %s2762_s4 = inlined_call_operand.vmem [shape: f32[1,9], index: 4, kind: input, shape index: {}]   ;;  %s2763_s5 = inlined_call_operand.hbm [shape: f32[16,128], index: 5, kind: output, shape index: {}]  }
   0x1 LB: > { %s2185_s19 = sadd.s32 4294967295, %s2132_s18   ;;  %p1568_p0 = scmp.ge.s32.totalorder %s2132_s18, 1  ;;  %s2132_s18 = sphi %s2179_s18, %s16_s18  }
   0x2   : > { %p195_p1 = scmp.lt.s32.totalorder %s2132_s18, 3 }
   0x4   : > { %p196_p2 = pnand %p1568_p0, %p195_p1 }
   0x5   : > { %s1569_s20 = sshll.u32 (!%p196_p2), %s2185_s19, 4  ;;  %p1573_p4 = scmp.ne.s32.totalorder (!%p196_p2), %s2185_s19, 0 }
   0x6   : > { %199 = sbr.rel (%p196_p2) target bundleno = 1408 (0x580), region = 40  ;;  %p224_p3 = scmp.lt.s32.totalorder (!%p196_p2), %s1569_s20, 31 }
   0xd   : > { %s2777_s20 = smov (!%p224_p3, %s1569_s20), 31  ;;  %238 = sbr.rel (%p1573_p4) target bundleno = 293 (0x125), region = 44 }
   0xe   : > { %s1570_s21 = sshll.u32 %s2777_s20, 3  ;;  %vm257_vm0 = vcmask (!%p1573_p4), 72704   ;;  %v473_v0 = vld [vmem:[%s2760_s2] sm:$0xff] (!%p1573_p4)  ;;  %v474_v1 = vld [vmem:[%s2760_s2 + $0x8] sm:$0xff] (!%p1573_p4)  ;;  %vm306_vm1 = vcmask (!%p1573_p4), 1040384   ;;  %v2134_v2 = vmov (!%p1573_p4), 0.0|0.0  }
   0xf   : > { %s2193_s24 = scalar_lea.vmem %s2758_s0, %s1570_s21  ;;  %s2198_s27 = scalar_lea.vmem %s2759_s1, %s1570_s21  ;;  %1932 = vmatprep.subr.bf16.mxu1 (!%p1573_p4), %v2134_v2  ;;  %v1933_v3 = vpack.c.bf16 (!%p1573_p4), %v474_v1, %v473_v0  ;;  %vm2210_vm2 = vmpackc.low (!%p1573_p4), %vm257_vm0, %vm257_vm0  ;;  %1770 = vmatprep.mubr.msk.f32.mxu0 (!%p1573_p4), %vm257_vm0, %v473_v0  ;;  %vm2135_vm3 = vmmov (!%p1573_p4), 0   ;;  %v2136_v5 = vmov (!%p1573_p4), 0.0   ;;  %v255_v6 = vld [vmem:[%s2761_s3] sm:$0xff] (!%p1573_p4)  ;;  %v256_v7 = vld [vmem:[%s2761_s3 + $0x8] sm:$0x1] (!%p1573_p4)  ;;  %vm2137_vm4 = vmmov (!%p1573_p4), 1  }
  0x10   : > { %1826 = vmatprep.mubr.msk.f32.mxu1 (!%p1573_p4), %vm2135_vm3, %v2136_v5  ;;  %611 = vst [vmem:[#allocation4] sm:$0xff] (!%p1573_p4), %v2136_v5  ;;  %612 = vst [vmem:[#allocation4 + $0x8] sm:$0xff] (!%p1573_p4), %v2136_v5  ;;  %v475_v8 = vld [vmem:[%s2760_s2 + $0x10] sm:$0xff] (!%p1573_p4)  ;;  %v476_v9 = vld [vmem:[%s2760_s2 + $0x18] sm:$0xff] (!%p1573_p4)  ;;  %v1926_v10 = vpack.c.bf16 (!%p1573_p4), %v256_v7, %v255_v6  ;;  %v2138_v31 = vmov (!%p1573_p4), -1e+30  }
  0x11   : > { %613 = vst [vmem:[#allocation4 + $0x10] sm:$0x3] (!%p1573_p4), %v2136_v5  ;;  %1935 = vmatpush3.bf16.xpose.msk.msra.mxu1 (!%p1573_p4), %vm2210_vm2, %v1933_v3  ;;  %vm1927_vm5 = vmpackc.low (!%p1573_p4), %vm306_vm1, %vm2137_vm4  ;;  %v1937_v11 = vpack.c.bf16 (!%p1573_p4), %v476_v9, %v475_v8  ;;  %v477_v12 = vld [vmem:[%s2760_s2 + $0x20] sm:$0xff] (!%p1573_p4)  ;;  %v478_v13 = vld [vmem:[%s2760_s2 + $0x28] sm:$0xff] (!%p1573_p4)  ;;  %vm455_vm6 = vcmask (!%p1573_p4), 146432  }
  0x12   : > { %1936 = vmatprep.subr.bf16.mxu1 (!%p1573_p4), %v2134_v2  ;;  %1928 = vmatprep.subr.msk.bf16.mxu0 (!%p1573_p4), %vm1927_vm5, %v1926_v10  ;;  %v1941_v14 = vpack.c.bf16 (!%p1573_p4), %v478_v13, %v477_v12  ;;  %v479_v15 = vld [vmem:[%s2760_s2 + $0x30] sm:$0xff] (!%p1573_p4)  ;;  %v480_v16 = vld [vmem:[%s2760_s2 + $0x38] sm:$0xff] (!%p1573_p4)  ;;  %v481_v17 = vld [vmem:[%s2760_s2 + $0x40] sm:$0xff] (!%p1573_p4)  ;;  %614 = vst [vmem:[#allocation5] sm:$0x1] (!%p1573_p4), %v2138_v31 }
  0x13   : > { %1931 = vmatpush3.bf16.msk.msra.mxu0 (!%p1573_p4), %vm1927_vm5, %v1926_v10  ;;  %v1945_v18 = vpack.c.bf16 (!%p1573_p4), %v480_v16, %v479_v15  ;;  %v482_v19 = vld [vmem:[%s2760_s2 + $0x48] sm:$0xff] (!%p1573_p4)  ;;  %v483_v20 = vld [vmem:[%s2760_s2 + $0x50] sm:$0xff] (!%p1573_p4)  ;;  %v484_v21 = vld [vmem:[%s2760_s2 + $0x58] sm:$0xff] (!%p1573_p4) }
  0x14   : > { %v485_v22 = vld [vmem:[%s2760_s2 + $0x60] sm:$0xff]  ;;  %v1949_v23 = vpack.c.bf16 %v482_v19, %v481_v17  ;;  %v486_v24 = vld [vmem:[%s2760_s2 + $0x68] sm:$0xff]  ;;  %v487_v25 = vld [vmem:[%s2760_s2 + $0x70] sm:$0xff]  ;;  %v1953_v27 = vpack.c.bf16 %v484_v21, %v483_v20 }
  0x15   : > { %v488_v26 = vld [vmem:[%s2760_s2 + $0x78] sm:$0xff]  ;;  %v1957_v28 = vpack.c.bf16 %v486_v24, %v485_v22  ;;  %v472_v30 = vld [vmem:[%s2762_s4] sm:$0x1] }
  0x16   : > { %1771 = vmatmul.mubr.msk.f32.vlgmr.msra.gmra.mrb[0].mxu0 %vm257_vm0, %v474_v1  ;;  %v1961_v29 = vpack.c.bf16 %v488_v26, %v487_v25 }
  0x17   : > { %1773 = vmatprep.mubr.msk.f32.mxu0 %vm257_vm0, %v475_v8 }
  0x19   : > { %1939 = vmatpush3.bf16.xpose.msk.msra.mxu1 %vm2210_vm2, %v1937_v11 }
  0x1a   : > { %1940 = vmatprep.subr.bf16.mxu1 %v2134_v2  ;;  %1774 = vmatmul.mubr.msk.f32.gmra.mrb[2].mxu0 %vm257_vm0, %v476_v9 }
  0x1b   : > { %1776 = vmatprep.mubr.msk.f32.mxu0 %vm257_vm0, %v477_v12 }
  0x1e   : > { %1777 = vmatmul.mubr.msk.f32.gmra.mrb[4].mxu0 %vm257_vm0, %v478_v13 }
  0x1f   : > { %1779 = vmatprep.mubr.msk.f32.mxu0 %vm257_vm0, %v479_v15 }
  0x21   : > { %1943 = vmatpush3.bf16.xpose.msk.msra.mxu1 %vm2210_vm2, %v1941_v14 }
  0x22   : > { %1944 = vmatprep.subr.bf16.mxu1 %v2134_v2  ;;  %1780 = vmatmul.mubr.msk.f32.gmra.mrb[6].mxu0 %vm257_vm0, %v480_v16 }
  0x23   : > { %1782 = vmatprep.mubr.msk.f32.mxu0 %vm257_vm0, %v481_v17 }
  0x26   : > { %1783 = vmatmul.mubr.msk.f32.gmra.mrb[8].mxu0 %vm257_vm0, %v482_v19 }
  0x27   : > { %1785 = vmatprep.mubr.msk.f32.mxu0 %vm257_vm0, %v483_v20 }
  0x29   : > { %1947 = vmatpush3.bf16.xpose.msk.msra.mxu1 %vm2210_vm2, %v1945_v18 }
  0x2a   : > { %1948 = vmatprep.subr.bf16.mxu1 %v2134_v2  ;;  %1786 = vmatmul.mubr.msk.f32.gmra.mrb[10].mxu0 %vm257_vm0, %v484_v21 }
  0x2b   : > { %1788 = vmatprep.mubr.msk.f32.mxu0 %vm257_vm0, %v485_v22 }
  0x2e   : > { %1789 = vmatmul.mubr.msk.f32.gmra.mrb[12].mxu0 %vm257_vm0, %v486_v24 }
  0x2f   : > { %1791 = vmatprep.mubr.msk.f32.mxu0 %vm257_vm0, %v487_v25 }
  0x31   : > { %1951 = vmatpush3.bf16.xpose.msk.msra.mxu1 %vm2210_vm2, %v1949_v23 }
  0x32   : > { %1952 = vmatprep.subr.bf16.mxu1 %v2134_v2  ;;  %1792 = vmatmul.mubr.msk.f32.gmra.mrb[14].mxu0 %vm257_vm0, %v488_v26 }
  0x39   : > { %1955 = vmatpush3.bf16.xpose.msk.msra.mxu1 %vm2210_vm2, %v1953_v27 }
  0x3a   : > { %1956 = vmatprep.subr.bf16.mxu1 %v2134_v2 }
  0x41   : > { %1959 = vmatpush3.bf16.xpose.msk.msra.mxu1 %vm2210_vm2, %v1957_v28 }
  0x42   : > { %1960 = vmatprep.subr.bf16.mxu1 %v2134_v2 }
  0x49   : > { %1963 = vmatpush3.bf16.xpose.msk.msra.mxu1 %vm2210_vm2, %v1961_v29 }
  0x50   : > { %1827 = vmatmul.mubr.msk.f32.vlgmr.msra.gmra.mrb[0].mxu1 %vm257_vm0, %v472_v30 }
  0xe9   : > { %v1772_v32 = vpop.f32.mrb[0].mxu0 }
  0xea   : > { %457 = vst.msk [vmem:[#allocation2 + $0x8] sm:$0xff] %vm455_vm6, %v1772_v32  ;;  %v376_v33 = vpop.f32.mrb[1].mxu0 }
  0xeb   : > { %456 = vst.msk [vmem:[#allocation2] sm:$0xff] %vm455_vm6, %v376_v33 }
  0xed   : > { %v1775_v34 = vpop.f32.mrb[2].mxu0 }
  0xee   : > { %459 = vst.msk [vmem:[#allocation2 + $0x18] sm:$0xff] %vm455_vm6, %v1775_v34  ;;  %v386_v35 = vpop.f32.mrb[3].mxu0 }
  0xef   : > { %458 = vst.msk [vmem:[#allocation2 + $0x10] sm:$0xff] %vm455_vm6, %v386_v35 }
  0xf1   : > { %v1778_v36 = vpop.f32.mrb[4].mxu0 }
  0xf2   : > { %461 = vst.msk [vmem:[#allocation2 + $0x28] sm:$0xff] %vm455_vm6, %v1778_v36  ;;  %v396_v37 = vpop.f32.mrb[5].mxu0 }
  0xf3   : > { %460 = vst.msk [vmem:[#allocation2 + $0x20] sm:$0xff] %vm455_vm6, %v396_v37 }
  0xf5   : > { %v1781_v38 = vpop.f32.mrb[6].mxu0 }
  0xf6   : > { %463 = vst.msk [vmem:[#allocation2 + $0x38] sm:$0xff] %vm455_vm6, %v1781_v38  ;;  %v406_v39 = vpop.f32.mrb[7].mxu0 }
  0xf7   : > { %462 = vst.msk [vmem:[#allocation2 + $0x30] sm:$0xff] %vm455_vm6, %v406_v39 }
  0xf9   : > { %v1784_v40 = vpop.f32.mrb[8].mxu0 }
  0xfa   : > { %465 = vst.msk [vmem:[#allocation2 + $0x48] sm:$0xff] %vm455_vm6, %v1784_v40  ;;  %v416_v41 = vpop.f32.mrb[9].mxu0 }
  0xfb   : > { %464 = vst.msk [vmem:[#allocation2 + $0x40] sm:$0xff] %vm455_vm6, %v416_v41 }
  0xfd   : > { %v1787_v42 = vpop.f32.mrb[10].mxu0 }
  0xfe   : > { %467 = vst.msk [vmem:[#allocation2 + $0x58] sm:$0xff] %vm455_vm6, %v1787_v42  ;;  %v426_v43 = vpop.f32.mrb[11].mxu0 }
  0xff   : > { %466 = vst.msk [vmem:[#allocation2 + $0x50] sm:$0xff] %vm455_vm6, %v426_v43 }
 0x101   : > { %v1790_v44 = vpop.f32.mrb[12].mxu0 }
 0x102   : > { %469 = vst.msk [vmem:[#allocation2 + $0x68] sm:$0xff] %vm455_vm6, %v1790_v44  ;;  %v436_v45 = vpop.f32.mrb[13].mxu0 }
 0x103   : > { %468 = vst.msk [vmem:[#allocation2 + $0x60] sm:$0xff] %vm455_vm6, %v436_v45 }
 0x105   : > { %v1793_v46 = vpop.f32.mrb[14].mxu0 }
 0x106   : > { %471 = vst.msk [vmem:[#allocation2 + $0x78] sm:$0xff] %vm455_vm6, %v1793_v46  ;;  %v446_v47 = vpop.f32.mrb[15].mxu0 }
 0x107   : > { %470 = vst.msk [vmem:[#allocation2 + $0x70] sm:$0xff] %vm455_vm6, %v446_v47 }
 0x123   : > { %v606_v48 = vpop.f32.mrb[0].mxu1 }
 0x124   : > { %610 = vst [vmem:[#allocation3] sm:$0x1] %v606_v48  ;;  %v1828_v49 = vpop.f32.mrb[1].mxu1 }
 0x125 PF: > { %v617_v50 = vld [vmem:[%s2193_s24 + $0x10] sm:$0xff]  ;;  %v615_v51 = vld [vmem:[%s2193_s24] sm:$0xff]  ;;  %v2139_v52 = vmov 0   ;;  %v618_v53 = vld [vmem:[%s2193_s24 + $0x18] sm:$0xff]  ;;  %v2140_v30 = vmov 0.0|0.0   ;;  %v2141_v42 = vmov 16   ;;  %v647_v43 = vlaneseq }
 0x126   : > { %2050 = vset.pattern.permute.xlu1 %v2139_v52  ;;  %2049 = vset.pattern.permute.xlu0 %v2139_v52  ;;  %v616_v54 = vld [vmem:[%s2193_s24 + $0x8] sm:$0xff]  ;;  %v619_v56 = vld [vmem:[%s2193_s24 + $0x20] sm:$0xff]  ;;  %v811_v59 = vld [vmem:[#allocation2 + $0x10] sm:$0xff]  ;;  %v2142_v47 = vmov 1.0   ;;  %p1673_p5 = scmp.ne.s32.totalorder %s2185_s19, 1 }
 0x127   : > { %656 = vperm.xlu1 %2050, %v617_v50   ;;  %650 = vperm.xlu0 %2049, %v615_v51   ;;  %v620_v55 = vld [vmem:[%s2193_s24 + $0x28] sm:$0xff]  ;;  %v809_v57 = vld [vmem:[#allocation2] sm:$0xff]  ;;  %v622_v60 = vld [vmem:[%s2193_s24 + $0x38] sm:$0xff]  ;;  %v2358_v44 = vand.u32 127, %v647_v43 }
 0x128   : > { %v810_v58 = vld [vmem:[#allocation2 + $0x8] sm:$0xff]  ;;  %v621_v61 = vld [vmem:[%s2193_s24 + $0x30] sm:$0xff]  ;;  %v812_v63 = vld [vmem:[#allocation2 + $0x18] sm:$0xff]  ;;  %1996 = vmatprep.subr.bf16.mxu1 %v2140_v30 }
 0x129   : > { %v1964_v62 = vpack.c.bf16 %v810_v58, %v809_v57  ;;  %v1968_v0 = vpack.c.bf16 %v812_v63, %v811_v59  ;;  %v813_v1 = vld [vmem:[#allocation2 + $0x20] sm:$0xff]  ;;  %v814_v2 = vld [vmem:[#allocation2 + $0x28] sm:$0xff]  ;;  %v815_v6 = vld [vmem:[#allocation2 + $0x30] sm:$0xff] }
 0x12a   : > { %v624_v3 = vld [vmem:[%s2193_s24 + $0x48] sm:$0xff]  ;;  %v623_v4 = vld [vmem:[%s2193_s24 + $0x40] sm:$0xff]  ;;  %v1972_v5 = vpack.c.bf16 %v814_v2, %v813_v1  ;;  %v816_v7 = vld [vmem:[#allocation2 + $0x38] sm:$0xff]  ;;  %v2143_v1 = vmov 1.0|1.0  }
 0x12b   : > { %659 = vperm.xlu1 %2050, %v618_v53   ;;  %653 = vperm.xlu0 %2049, %v616_v54   ;;  %v626_v8 = vld [vmem:[%s2193_s24 + $0x58] sm:$0xff]  ;;  %v625_v9 = vld [vmem:[%s2193_s24 + $0x50] sm:$0xff]  ;;  %v1976_v10 = vpack.c.bf16 %v816_v7, %v815_v6  ;;  %v817_v11 = vld [vmem:[#allocation2 + $0x40] sm:$0xff] }
 0x12c   : > { %1965 = vmatprep.subr.bf16.mxu0 %v1964_v62  ;;  %v818_v12 = vld [vmem:[#allocation2 + $0x48] sm:$0xff]  ;;  %v627_v14 = vld [vmem:[%s2193_s24 + $0x60] sm:$0xff]  ;;  %v819_v16 = vld [vmem:[#allocation2 + $0x50] sm:$0xff] }
 0x12d   : > { %1967 = vmatpush3.bf16.msra.mxu0 %v1964_v62  ;;  %v628_v13 = vld [vmem:[%s2193_s24 + $0x68] sm:$0xff]  ;;  %v1980_v15 = vpack.c.bf16 %v818_v12, %v817_v11  ;;  %v820_v17 = vld [vmem:[#allocation2 + $0x58] sm:$0xff]  ;;  %v629_v19 = vld [vmem:[%s2193_s24 + $0x70] sm:$0xff] }
 0x12e   : > { %1969 = vmatprep.subr.bf16.mxu0 %v1968_v0  ;;  %v630_v18 = vld [vmem:[%s2193_s24 + $0x78] sm:$0xff]  ;;  %v1984_v20 = vpack.c.bf16 %v820_v17, %v819_v16  ;;  %v821_v21 = vld [vmem:[#allocation2 + $0x60] sm:$0xff]  ;;  %v822_v22 = vld [vmem:[#allocation2 + $0x68] sm:$0xff] }
 0x12f   : > { %665 = vperm.xlu1 %2050, %v620_v55   ;;  %662 = vperm.xlu0 %2049, %v619_v56   ;;  %v631_v23 = vld [vmem:[%s2198_s27] sm:$0xff]  ;;  %v632_v24 = vld [vmem:[%s2198_s27 + $0x8] sm:$0xff]  ;;  %v1988_v25 = vpack.c.bf16 %v822_v22, %v821_v21  ;;  %v823_v26 = vld [vmem:[#allocation2 + $0x70] sm:$0xff] }
 0x130   : > { %v824_v27 = vld [vmem:[#allocation2 + $0x78] sm:$0xff]  ;;  %v633_v28 = vld [vmem:[%s2198_s27 + $0x10] sm:$0xff]  ;;  %v635_v29 = vld [vmem:[%s2198_s27 + $0x20] sm:$0xff] }
 0x131   : > { %1971 = vmatpush3.bf16.msra.mxu0 %v1968_v0  ;;  %v1992_v31 = vpack.c.bf16 %v824_v27, %v823_v26  ;;  %v634_v32 = vld [vmem:[%s2198_s27 + $0x18] sm:$0xff]  ;;  %v637_v33 = vld [vmem:[%s2198_s27 + $0x30] sm:$0xff]  ;;  %v636_v34 = vld [vmem:[%s2198_s27 + $0x28] sm:$0xff] }
 0x132   : > { %1973 = vmatprep.subr.bf16.mxu0 %v1972_v5  ;;  %v640_v35 = vld [vmem:[%s2198_s27 + $0x48] sm:$0xff]  ;;  %v638_v36 = vld [vmem:[%s2198_s27 + $0x38] sm:$0xff]  ;;  %v643_v37 = vld [vmem:[%s2198_s27 + $0x60] sm:$0xff] }
 0x133   : > { %671 = vperm.xlu1 %2050, %v622_v60   ;;  %668 = vperm.xlu0 %2049, %v621_v61   ;;  %v639_v38 = vld [vmem:[%s2198_s27 + $0x40] sm:$0xff]  ;;  %v641_v39 = vld [vmem:[%s2198_s27 + $0x50] sm:$0xff]  ;;  %v642_v40 = vld [vmem:[%s2198_s27 + $0x58] sm:$0xff] }
 0x134   : > { %v644_v41 = vld [vmem:[%s2198_s27 + $0x68] sm:$0xff] }
 0x135   : > { %1975 = vmatpush3.bf16.msra.mxu0 %v1972_v5 }
 0x136   : > { %1977 = vmatprep.subr.bf16.mxu0 %v1976_v10 }
 0x137   : > { %677 = vperm.xlu1 %2050, %v624_v3   ;;  %674 = vperm.xlu0 %2049, %v623_v4  }
 0x139   : > { %1979 = vmatpush3.bf16.msra.mxu0 %v1976_v10 }
 0x13a   : > { %1981 = vmatprep.subr.bf16.mxu0 %v1980_v15 }
 0x13b   : > { %683 = vperm.xlu1 %2050, %v626_v8   ;;  %680 = vperm.xlu0 %2049, %v625_v9  }
 0x13d   : > { %1983 = vmatpush3.bf16.msra.mxu0 %v1980_v15 }
 0x13e   : > { %1985 = vmatprep.subr.bf16.mxu0 %v1984_v20 }
 0x13f   : > { %689 = vperm.xlu1 %2050, %v628_v13   ;;  %686 = vperm.xlu0 %2049, %v627_v14  }
 0x141   : > { %1987 = vmatpush3.bf16.msra.mxu0 %v1984_v20 }
 0x142   : > { %1989 = vmatprep.subr.bf16.mxu0 %v1988_v25 }
 0x143   : > { %695 = vperm.xlu1 %2050, %v630_v18   ;;  %692 = vperm.xlu0 %2049, %v629_v19  }
 0x145   : > { %1991 = vmatpush3.bf16.msra.mxu0 %v1988_v25 }
 0x146   : > { %1993 = vmatprep.subr.bf16.mxu0 %v1992_v31 }
 0x147   : > { %714 = vperm.xlu1 %2050, %v631_v23   ;;  %717 = vperm.xlu0 %2049, %v632_v24  }
 0x149   : > { %1995 = vmatpush3.bf16.msra.mxu0 %v1992_v31  ;;  %v646_v31 = vld [vmem:[%s2198_s27 + $0x78] sm:$0xff] }
 0x14b   : > { %720 = vperm.xlu1 %2050, %v633_v28   ;;  %726 = vperm.xlu0 %2049, %v635_v29  }
 0x14f   : > { %723 = vperm.xlu1 %2050, %v634_v32   ;;  %732 = vperm.xlu0 %2049, %v637_v33   ;;  %v2541_v32 = vld [vmem:[#allocation3] ss:$0 sm:$0xff] }
 0x153   : > { %729 = vperm.xlu1 %2050, %v636_v34   ;;  %741 = vperm.xlu0 %2049, %v640_v35  }
 0x157   : > { %735 = vperm.xlu1 %2050, %v638_v36   ;;  %750 = vperm.xlu0 %2049, %v643_v37  }
 0x15b   : > { %738 = vperm.xlu1 %2050, %v639_v38   ;;  %2052 = vset.pattern.permute.xlu0 %v2141_v42 }
 0x15f   : > { %744 = vperm.xlu1 %2050, %v641_v39  }
 0x163   : > { %747 = vperm.xlu1 %2050, %v642_v40  }
 0x167   : > { %753 = vperm.xlu1 %2050, %v644_v41  }
 0x16b   : > { %2051 = vset.pattern.permute.xlu1 %v2141_v42 }
 0x1a6   : > { %v657_v45 = vpop.permute.xlu1 %656  ;;  %v651_v46 = vpop.permute.xlu0 %650 }
 0x1a7   : > { %vm697_vm7 = vcmp.eq.s32.totalorder %v651_v46, %v2358_v44  ;;  %vm699_vm8 = vcmp.eq.s32.totalorder %v657_v45, %v2358_v44 }
 0x1a8   : > { %1861 = vmatprep.mubr.msk.f32.mxu0 %vm697_vm7, %v2142_v47 }
 0x1aa   : > { %v660_v48 = vpop.permute.xlu1 %659  ;;  %v654_v49 = vpop.permute.xlu0 %653 }
 0x1ab   : > { %vm698_vm9 = vcmp.eq.s32.totalorder %v654_v49, %v2358_v44  ;;  %vm700_vm10 = vcmp.eq.s32.totalorder %v660_v48, %v2358_v44 }
 0x1ac   : > { %1862 = vmatmul.mubr.msk.f32.vlgmr.msra.gmra.mrb[0].mxu0 %vm698_vm9, %v2142_v47 }
 0x1ad   : > { %1864 = vmatprep.mubr.msk.f32.mxu0 %vm699_vm8, %v2142_v47 }
 0x1ae   : > { %v666_v50 = vpop.permute.xlu1 %665  ;;  %v663_v51 = vpop.permute.xlu0 %662 }
 0x1af   : > { %vm701_vm11 = vcmp.eq.s32.totalorder %v663_v51, %v2358_v44  ;;  %vm702_vm12 = vcmp.eq.s32.totalorder %v666_v50, %v2358_v44 }
 0x1b0   : > { %1865 = vmatmul.mubr.msk.f32.gmra.mrb[2].mxu0 %vm700_vm10, %v2142_v47 }
 0x1b1   : > { %1867 = vmatprep.mubr.msk.f32.mxu0 %vm701_vm11, %v2142_v47 }
 0x1b2   : > { %v672_v53 = vpop.permute.xlu1 %671  ;;  %v669_v54 = vpop.permute.xlu0 %668 }
 0x1b3   : > { %vm703_vm13 = vcmp.eq.s32.totalorder %v669_v54, %v2358_v44  ;;  %vm704_vm14 = vcmp.eq.s32.totalorder %v672_v53, %v2358_v44 }
 0x1b4   : > { %1868 = vmatmul.mubr.msk.f32.gmra.mrb[4].mxu0 %vm702_vm12, %v2142_v47 }
 0x1b5   : > { %1870 = vmatprep.mubr.msk.f32.mxu0 %vm703_vm13, %v2142_v47 }
 0x1b6   : > { %v678_v55 = vpop.permute.xlu1 %677  ;;  %v675_v56 = vpop.permute.xlu0 %674 }
 0x1b7   : > { %vm705_vm15 = vcmp.eq.s32.totalorder %v675_v56, %v2358_v44  ;;  %vm706_vm0 = vcmp.eq.s32.totalorder %v678_v55, %v2358_v44 }
 0x1b8   : > { %1871 = vmatmul.mubr.msk.f32.gmra.mrb[6].mxu0 %vm704_vm14, %v2142_v47 }
 0x1b9   : > { %1873 = vmatprep.mubr.msk.f32.mxu0 %vm705_vm15, %v2142_v47 }
 0x1ba   : > { %v684_v57 = vpop.permute.xlu1 %683  ;;  %v681_v58 = vpop.permute.xlu0 %680 }
 0x1bb   : > { %vm707_vm1 = vcmp.eq.s32.totalorder %v681_v58, %v2358_v44  ;;  %vm708_vm2 = vcmp.eq.s32.totalorder %v684_v57, %v2358_v44 }
 0x1bc   : > { %1874 = vmatmul.mubr.msk.f32.gmra.mrb[8].mxu0 %vm706_vm0, %v2142_v47 }
 0x1bd   : > { %1876 = vmatprep.mubr.msk.f32.mxu0 %vm707_vm1, %v2142_v47 }
 0x1be   : > { %v690_v59 = vpop.permute.xlu1 %689  ;;  %v687_v60 = vpop.permute.xlu0 %686 }
 0x1bf   : > { %vm709_vm3 = vcmp.eq.s32.totalorder %v687_v60, %v2358_v44  ;;  %vm710_vm4 = vcmp.eq.s32.totalorder %v690_v59, %v2358_v44 }
 0x1c0   : > { %1877 = vmatmul.mubr.msk.f32.gmra.mrb[10].mxu0 %vm708_vm2, %v2142_v47 }
 0x1c1   : > { %1879 = vmatprep.mubr.msk.f32.mxu0 %vm709_vm3, %v2142_v47 }
 0x1c2   : > { %v696_v61 = vpop.permute.xlu1 %695  ;;  %v693_v62 = vpop.permute.xlu0 %692 }
 0x1c3   : > { %vm711_vm5 = vcmp.eq.s32.totalorder %v693_v62, %v2358_v44  ;;  %vm712_vm6 = vcmp.eq.s32.totalorder %v696_v61, %v2358_v44 }
 0x1c4   : > { %1880 = vmatmul.mubr.msk.f32.gmra.mrb[12].mxu0 %vm710_vm4, %v2142_v47 }
 0x1c5   : > { %1882 = vmatprep.mubr.msk.f32.mxu0 %vm711_vm5, %v2142_v47 }
 0x1c6   : > { %v2375_v63 = vpop.permute.xlu1 %714  ;;  %v2377_v0 = vpop.permute.xlu0 %717 }
 0x1c7   : > { %vm761_vm7 = vcmp.eq.s32.totalorder %v2375_v63, %v2358_v44  ;;  %vm762_vm8 = vcmp.eq.s32.totalorder %v2377_v0, %v2358_v44 }
 0x1c8   : > { %1883 = vmatmul.mubr.msk.f32.gmra.mrb[14].mxu0 %vm712_vm6, %v2142_v47  ;;  %vm1997_vm9 = vmpackc.low %vm762_vm8, %vm761_vm7 }
 0x1c9   : > { %1998 = vmatpush3.bf16.msk.msra.mxu1 %vm1997_vm9, %v2143_v1 }
 0x1ca   : > { %v2391_v2 = vpop.permute.xlu1 %720  ;;  %1999 = vmatprep.subr.bf16.mxu1 %v2140_v30  ;;  %v2394_v3 = vpop.permute.xlu0 %726 }
 0x1cb   : > { %vm763_vm10 = vcmp.eq.s32.totalorder %v2391_v2, %v2358_v44  ;;  %vm765_vm13 = vcmp.eq.s32.totalorder %v2394_v3, %v2358_v44 }
 0x1ce   : > { %v2396_v4 = vpop.permute.xlu1 %723  ;;  %v2409_v5 = vpop.permute.xlu0 %732 }
 0x1cf   : > { %vm2766_vm11 = vcmp.eq.s32.totalorder %v2396_v4, %v2358_v44  ;;  %vm767_vm0 = vcmp.eq.s32.totalorder %v2409_v5, %v2358_v44 }
 0x1d0   : > { %vm2000_vm12 = vmpackc.low %vm2766_vm11, %vm763_vm10 }
 0x1d1   : > { %2001 = vmatpush3.bf16.msk.msra.mxu1 %vm2000_vm12, %v2143_v1 }
 0x1d2   : > { %v2411_v6 = vpop.permute.xlu1 %729  ;;  %2002 = vmatprep.subr.bf16.mxu1 %v2140_v30  ;;  %v2432_v8 = vpop.permute.xlu0 %741 }
 0x1d3   : > { %vm766_vm14 = vcmp.eq.s32.totalorder %v2411_v6, %v2358_v44  ;;  %vm770_vm3 = vcmp.eq.s32.totalorder %v2432_v8, %v2358_v44 }
 0x1d4   : > { %vm2003_vm15 = vmpackc.low %vm766_vm14, %vm765_vm13 }
 0x1d5   : > { %2004 = vmatpush3.bf16.msk.msra.mxu1 %vm2003_vm15, %v2143_v1 }
 0x1d6   : > { %v2425_v7 = vpop.permute.xlu1 %735  ;;  %2005 = vmatprep.subr.bf16.mxu1 %v2140_v30  ;;  %v2464_v12 = vpop.permute.xlu0 %750 }
 0x1d7   : > { %vm768_vm1 = vcmp.eq.s32.totalorder %v2425_v7, %v2358_v44  ;;  %vm2764_vm15 = vcmp.eq.s32.totalorder %v2464_v12, %v2358_v44 }
 0x1d8   : > { %vm2006_vm2 = vmpackc.low %vm768_vm1, %vm767_vm0 }
 0x1d9   : > { %2007 = vmatpush3.bf16.msk.msra.mxu1 %vm2006_vm2, %v2143_v1 }
 0x1da   : > { %v2441_v9 = vpop.permute.xlu1 %738  ;;  %2008 = vmatprep.subr.bf16.mxu1 %v2140_v30 }
 0x1db   : > { %vm769_vm4 = vcmp.eq.s32.totalorder %v2441_v9, %v2358_v44 }
 0x1dc   : > { %vm2009_vm5 = vmpackc.low %vm770_vm3, %vm769_vm4 }
 0x1dd   : > { %2010 = vmatpush3.bf16.msk.msra.mxu1 %vm2009_vm5, %v2143_v1 }
 0x1de   : > { %v2455_v10 = vpop.permute.xlu1 %744  ;;  %2011 = vmatprep.subr.bf16.mxu1 %v2140_v30 }
 0x1df   : > { %vm771_vm6 = vcmp.eq.s32.totalorder %v2455_v10, %v2358_v44 }
 0x1e2   : > { %v2458_v11 = vpop.permute.xlu1 %747 }
 0x1e3   : > { %vm2767_vm9 = vcmp.eq.s32.totalorder %v2458_v11, %v2358_v44 }
 0x1e4   : > { %vm2012_vm12 = vmpackc.low %vm2767_vm9, %vm771_vm6 }
 0x1e5   : > { %2013 = vmatpush3.bf16.msk.msra.mxu1 %vm2012_vm12, %v2143_v1 }
 0x1e6   : > { %v2473_v13 = vpop.permute.xlu1 %753  ;;  %2014 = vmatprep.subr.bf16.mxu1 %v2140_v30 }
 0x1e7   : > { %vm2765_vm2 = vcmp.eq.s32.totalorder %v2473_v13, %v2358_v44 }
 0x1e8   : > { %vm2015_vm5 = vmpackc.low %vm2765_vm2, %vm2764_vm15 }
 0x1e9   : > { %2016 = vmatpush3.bf16.msk.msra.mxu1 %vm2015_vm5, %v2143_v1 }
 0x1ea   : > { %2017 = vmatprep.subr.bf16.mxu1 %v2140_v30  ;;  %v645_v30 = vld [vmem:[%s2198_s27 + $0x70] sm:$0xff] }
 0x27f   : > { %v2488_v14 = vpop.f32.mrb[0].mxu0 }
 0x280   : > { %978 = vperm.xlu1 %2051, %v2488_v14   ;;  %v2491_v15 = vpop.f32.mrb[1].mxu0 }
 0x281   : > { %973 = vperm.xlu0 %2052, %v2491_v15  }
 0x283   : > { %v2494_v16 = vpop.f32.mrb[2].mxu0 }
 0x284   : > { %v2496_v17 = vpop.f32.mrb[3].mxu0 }
 0x285   : > { %988 = vperm.xlu0 %2052, %v2494_v16   ;;  %983 = vperm.xlu1 %2051, %v2496_v17  }
 0x287   : > { %v2500_v18 = vpop.f32.mrb[4].mxu0 }
 0x288   : > { %v2502_v19 = vpop.f32.mrb[5].mxu0 }
 0x289   : > { %998 = vperm.xlu0 %2052, %v2500_v18   ;;  %993 = vperm.xlu1 %2051, %v2502_v19  }
 0x28b   : > { %v2506_v20 = vpop.f32.mrb[6].mxu0 }
 0x28c   : > { %v2508_v21 = vpop.f32.mrb[7].mxu0 }
 0x28d   : > { %1008 = vperm.xlu0 %2052, %v2506_v20   ;;  %1003 = vperm.xlu1 %2051, %v2508_v21  }
 0x28f   : > { %v2512_v22 = vpop.f32.mrb[8].mxu0 }
 0x290   : > { %v2514_v23 = vpop.f32.mrb[9].mxu0 }
 0x291   : > { %1018 = vperm.xlu0 %2052, %v2512_v22   ;;  %1013 = vperm.xlu1 %2051, %v2514_v23  }
 0x293   : > { %v2518_v24 = vpop.f32.mrb[10].mxu0 }
 0x294   : > { %v2520_v25 = vpop.f32.mrb[11].mxu0 }
 0x295   : > { %1028 = vperm.xlu0 %2052, %v2518_v24   ;;  %1023 = vperm.xlu1 %2051, %v2520_v25  }
 0x297   : > { %v2524_v26 = vpop.f32.mrb[12].mxu0 }
 0x298   : > { %v2526_v27 = vpop.f32.mrb[13].mxu0 }
 0x299   : > { %1038 = vperm.xlu1 %2051, %v2524_v26   ;;  %1033 = vperm.xlu0 %2052, %v2526_v27  }
 0x29b   : > { %v2530_v28 = vpop.f32.mrb[14].mxu0 }
 0x29c   : > { %v2532_v29 = vpop.f32.mrb[15].mxu0 }
 0x29d   : > { %1048 = vperm.xlu0 %2052, %v2530_v28   ;;  %1043 = vperm.xlu1 %2051, %v2532_v29  }
 0x2a1   : > { %2053 = vset.pattern.permute.xlu0 %v2139_v52  ;;  %2054 = vset.pattern.permute.xlu1 %v2139_v52 }
 0x2a2   : > { %756 = vperm.xlu0 %2053, %v645_v30   ;;  %759 = vperm.xlu1 %2054, %v646_v31  }
 0x2a6   : > { %2055 = vset.pattern.permute.xlu0 %v2141_v42 }
 0x2ff   : > { %v979_v33 = vpop.permute.xlu1 %978 }
 0x300   : > { %v1058_v34 = vadd.f32 %v2541_v32, %v979_v33  ;;  %v974_v35 = vpop.permute.xlu0 %973 }
 0x301   : > { %v1057_v36 = vadd.f32 %v2541_v32, %v974_v35 }
 0x302   : > { %v1090_v37 = vmul.f32 0.2, %v1058_v34  ;;  %vm1074_vm12 = vcmp.gt.f32.partialorder %v1058_v34, 0.0 }
 0x303   : > { %v1089_v38 = vmul.f32 0.2, %v1057_v36  ;;  %vm1073_vm5 = vcmp.gt.f32.partialorder %v1057_v36, 0.0 }
 0x304   : > { %v984_v39 = vpop.permute.xlu1 %983  ;;  %v989_v40 = vpop.permute.xlu0 %988  ;;  %v1106_v41 = vsel %vm1074_vm12, %v1058_v34, %v1090_v37 }
 0x305   : > { %v1059_v52 = vadd.f32 %v2541_v32, %v984_v39  ;;  %v1060_v45 = vadd.f32 %v2541_v32, %v989_v40  ;;  %v2550_v42 = vsel %vm762_vm8, %v1106_v41, -1e+30  ;;  %v1105_v46 = vsel %vm1073_vm5, %v1057_v36, %v1089_v38 }
 0x306   : > { %1165 = vmax.xlane.f32.xlu0 %v2550_v42  ;;  %v2557_v53 = vsel %vm761_vm7, %v1105_v46, -1e+30 }
 0x307   : > { %v1091_v47 = vmul.f32 0.2, %v1059_v52  ;;  %v1092_v48 = vmul.f32 0.2, %v1060_v45  ;;  %vm1076_vm15 = vcmp.gt.f32.partialorder %v1060_v45, 0.0  ;;  %vm1075_vm2 = vcmp.gt.f32.partialorder %v1059_v52, 0.0 }
 0x308   : > { %v994_v49 = vpop.permute.xlu1 %993  ;;  %v999_v50 = vpop.permute.xlu0 %998 }
 0x309   : > { %v1062_v51 = vadd.f32 %v2541_v32, %v999_v50  ;;  %v1108_v54 = vsel %vm1076_vm15, %v1060_v45, %v1092_v48  ;;  %v1061_v56 = vadd.f32 %v2541_v32, %v994_v49  ;;  %v1107_v58 = vsel %vm1075_vm2, %v1059_v52, %v1091_v47 }
 0x30a   : > { %1163 = vmax.xlane.f32.xlu0 %v2557_v53  ;;  %v2563_v55 = vsel %vm2766_vm11, %v1108_v54, -1e+30  ;;  %v2571_v62 = vsel %vm763_vm10, %v1107_v58, -1e+30 }
 0x30b   : > { %v1094_v57 = vmul.f32 0.2, %v1062_v51  ;;  %1169 = vmax.xlane.f32.xlu1 %v2563_v55  ;;  %vm1078_vm12 = vcmp.gt.f32.partialorder %v1062_v51, 0.0  ;;  %v1093_v30 = vmul.f32 0.2, %v1061_v56  ;;  %vm1077_vm15 = vcmp.gt.f32.partialorder %v1061_v56, 0.0 }
 0x30c   : > { %v1004_v59 = vpop.permute.xlu1 %1003  ;;  %v1009_v60 = vpop.permute.xlu0 %1008 }
 0x30d   : > { %v1064_v61 = vadd.f32 %v2541_v32, %v1009_v60  ;;  %v1063_v31 = vadd.f32 %v2541_v32, %v1004_v59  ;;  %v1110_v33 = vsel %vm1078_vm12, %v1062_v51, %v1094_v57  ;;  %v1109_v41 = vsel %vm1077_vm15, %v1061_v56, %v1093_v30 }
 0x30e   : > { %v1126_v39 = vsel %vm766_vm14, %v1110_v33, -1e+30  ;;  %v1125_v51 = vsel %vm765_vm13, %v1109_v41, -1e+30 }
 0x30f   : > { %1167 = vmax.xlane.f32.xlu1 %v2571_v62  ;;  %v1096_v34 = vmul.f32 0.2, %v1064_v61  ;;  %vm1080_vm2 = vcmp.gt.f32.partialorder %v1064_v61, 0.0  ;;  %v1095_v40 = vmul.f32 0.2, %v1063_v31  ;;  %vm1079_vm5 = vcmp.gt.f32.partialorder %v1063_v31, 0.0 }
 0x310   : > { %v1014_v35 = vpop.permute.xlu1 %1013  ;;  %v1019_v36 = vpop.permute.xlu0 %1018  ;;  %v1138_v41 = vmax.f32 %v2557_v53, %v1125_v51 }
 0x311   : > { %v1065_v37 = vadd.f32 %v2541_v32, %v1014_v35  ;;  %v1066_v38 = vadd.f32 %v2541_v32, %v1019_v36  ;;  %v1112_v47 = vsel %vm1080_vm2, %v1064_v61, %v1096_v34  ;;  %v1111_v58 = vsel %vm1079_vm5, %v1063_v31, %v1095_v40 }
 0x312   : > { %v1128_v56 = vsel %vm768_vm1, %v1112_v47, -1e+30  ;;  %v1139_v36 = vmax.f32 %v2550_v42, %v1126_v39  ;;  %v1127_v31 = vsel %vm767_vm0, %v1111_v58, -1e+30 }
 0x313   : > { %1173 = vmax.xlane.f32.xlu1 %v1126_v39  ;;  %v1098_v52 = vmul.f32 0.2, %v1066_v38  ;;  %v1097_v48 = vmul.f32 0.2, %v1065_v37  ;;  %vm1082_vm12 = vcmp.gt.f32.partialorder %v1066_v38, 0.0  ;;  %vm1081_vm11 = vcmp.gt.f32.partialorder %v1065_v37, 0.0 }
 0x314   : > { %v1024_v45 = vpop.permute.xlu1 %1023  ;;  %v1029_v46 = vpop.permute.xlu0 %1028 }
 0x315   : > { %v1067_v49 = vadd.f32 %v2541_v32, %v1024_v45  ;;  %v1068_v50 = vadd.f32 %v2541_v32, %v1029_v46  ;;  %v1114_v61 = vsel %vm1082_vm12, %v1066_v38, %v1098_v52  ;;  %v1113_v34 = vsel %vm1081_vm11, %v1065_v37, %v1097_v48 }
 0x316   : > { %v1141_v45 = vmax.f32 %v2563_v55, %v1128_v56  ;;  %v1130_v52 = vsel %vm770_vm3, %v1114_v61, -1e+30  ;;  %v1129_v42 = vsel %vm769_vm4, %v1113_v34, -1e+30  ;;  %vm2770_vm12 = vcmp.eq.s32.totalorder %v2473_v13, %v2358_v44 }
 0x317   : > { %v1099_v54 = vmul.f32 0.2, %v1067_v49  ;;  %v1100_v57 = vmul.f32 0.2, %v1068_v50  ;;  %1171 = vmax.xlane.f32.xlu1 %v1125_v51  ;;  %vm1084_vm15 = vcmp.gt.f32.partialorder %v1068_v50, 0.0  ;;  %vm1083_vm2 = vcmp.gt.f32.partialorder %v1067_v49, 0.0 }
 0x318   : > { %v1039_v59 = vpop.permute.xlu1 %1038  ;;  %v1034_v60 = vpop.permute.xlu0 %1033  ;;  %v1143_v58 = vmax.f32 %v1139_v36, %v1130_v52 }
 0x319   : > { %v1070_v30 = vadd.f32 %v2541_v32, %v1039_v59  ;;  %v1069_v33 = vadd.f32 %v2541_v32, %v1034_v60  ;;  %v1116_v35 = vsel %vm1084_vm15, %v1068_v50, %v1100_v57  ;;  %v1115_v46 = vsel %vm1083_vm2, %v1067_v49, %v1099_v54 }
 0x31a   : > { %v1132_v53 = vsel %vm2767_vm9, %v1116_v35, -1e+30  ;;  %v1140_v49 = vmax.f32 %v2571_v62, %v1127_v31  ;;  %v1131_v51 = vsel %vm771_vm6, %v1115_v46, -1e+30  ;;  %vm2771_vm15 = vcmp.eq.s32.totalorder %v2464_v12, %v2358_v44 }
 0x31b   : > { %v1102_v40 = vmul.f32 0.2, %v1070_v30  ;;  %v1101_v38 = vmul.f32 0.2, %v1069_v33  ;;  %1177 = vmax.xlane.f32.xlu1 %v1128_v56  ;;  %vm1086_vm11 = vcmp.gt.f32.partialorder %v1070_v30, 0.0  ;;  %vm1085_vm5 = vcmp.gt.f32.partialorder %v1069_v33, 0.0 }
 0x31c   : > { %v1044_v37 = vpop.permute.xlu1 %1043  ;;  %v1049_v47 = vpop.permute.xlu0 %1048  ;;  %v1142_v59 = vmax.f32 %v1138_v41, %v1129_v42  ;;  %v1144_v34 = vmax.f32 %v1140_v49, %v1131_v51 }
 0x31d   : > { %v1071_v55 = vadd.f32 %v2541_v32, %v1044_v37  ;;  %v1072_v39 = vadd.f32 %v2541_v32, %v1049_v47  ;;  %v1118_v48 = vsel %vm1086_vm11, %v1070_v30, %v1102_v40  ;;  %v1117_v50 = vsel %vm1085_vm5, %v1069_v33, %v1101_v38 }
 0x31e   : > { %v1134_v54 = vsel %vm2770_vm12, %v1118_v48, -1e+30  ;;  %v1133_v57 = vsel %vm2771_vm15, %v1117_v50, -1e+30  ;;  %v1145_v33 = vmax.f32 %v1141_v45, %v1132_v53  ;;  %v1197_v48 = vshrl.u32 %v647_v43, 7 }
 0x31f   : > { %vm1087_vm2 = vcmp.gt.f32.partialorder %v1071_v55, 0.0  ;;  %v1103_v56 = vmul.f32 0.2, %v1071_v55  ;;  %vm1088_vm9 = vcmp.gt.f32.partialorder %v1072_v39, 0.0  ;;  %v1104_v32 = vmul.f32 0.2, %v1072_v39  ;;  %1175 = vmax.xlane.f32.xlu1 %v1127_v31 }
 0x320   : > { %v1147_v35 = vmax.f32 %v1143_v58, %v1134_v54  ;;  %v1146_v40 = vmax.f32 %v1142_v59, %v1133_v57  ;;  %vm2772_vm12 = vcmp.eq.s32.totalorder %v2396_v4, %v2358_v44 }
 0x321   : > { %v2617_v62 = vpop.permute.xlu1 %759  ;;  %v1120_v60 = vsel %vm1088_vm9, %v1072_v39, %v1104_v32  ;;  %v1119_v61 = vsel %vm1087_vm2, %v1071_v55, %v1103_v56  ;;  %v2619_v30 = vpop.permute.xlu0 %756  ;;  %v1137_v56 = vld [vmem:[#allocation5] sm:$0x1] }
 0x322   : > { %vm776_vm11 = vcmp.eq.s32.totalorder %v2617_v62, %v2358_v44  ;;  %vm775_vm5 = vcmp.eq.s32.totalorder %v2619_v30, %v2358_v44  ;;  %v1150_v46 = vmax.f32 %v1146_v40, %v1147_v35 }
 0x323   : > { %v1136_v36 = vsel %vm776_vm11, %v1120_v60, -1e+30  ;;  %v1135_v41 = vsel %vm775_vm5, %v1119_v61, -1e+30  ;;  %vm2018_vm9 = vmpackc.low %vm776_vm11, %vm775_vm5  ;;  %1181 = vmax.xlane.f32.xlu1 %v1130_v52  ;;  %v2639_v52 = vsub.s32 0, %v1197_v48  ;;  %v2145_v61 = vmov 0.0  }
 0x324   : > { %2019 = vmatpush3.bf16.msk.msra.mxu1 %vm2018_vm9, %v2143_v1  ;;  %v1149_v45 = vmax.f32 %v1145_v33, %v1136_v36  ;;  %v1148_v31 = vmax.f32 %v1144_v34, %v1135_v41 }
 0x326   : > { %v1151_v38 = vmax.f32 %v1148_v31, %v1149_v45 }
 0x327   : > { %1179 = vmax.xlane.f32.xlu1 %v1129_v42 }
 0x328   : > { %v1152_v37 = vmax.f32 %v1150_v46, %v1151_v38 }
 0x32a   : > { %v1153_v47 = vrot.slane %v1152_v37, 4 }
 0x32b   : > { %1185 = vmax.xlane.f32.xlu1 %v1132_v53 }
 0x32c   : > { %v1154_v55 = vmax.f32 %v1152_v37, %v1153_v47 }
 0x32e   : > { %v1155_v39 = vrot.slane %v1154_v55, 2 }
 0x32f   : > { %1183 = vmax.xlane.f32.xlu1 %v1131_v51 }
 0x330   : > { %v1156_v50 = vmax.f32 %v1154_v55, %v1155_v39 }
 0x332   : > { %v1157_v49 = vrot.slane %v1156_v50, 1 }
 0x333   : > { %1189 = vmax.xlane.f32.xlu1 %v1134_v54 }
 0x334   : > { %v1158_v1 = vmax.f32 %v1156_v50, %v1157_v49 }
 0x336   : > { %v1159_v32 = vmax.f32 %v1137_v56, %v1158_v1 }
 0x337   : > { %1187 = vmax.xlane.f32.xlu1 %v1133_v57 }
 0x338   : > { %v1160_v58 = vsub.f32 %v1137_v56, %v1159_v32  ;;  %v1199_v42 = vrot.slane %v1159_v32, %v2639_v52  ;;  %1475 = vst [vmem:[#allocation5] sm:$0x1] %v1159_v32 }
 0x33a   : > { %v1202_v53 = vsel %vm762_vm8, %v1199_v42, -1e+30  ;;  %v1201_v43 = vsel %vm761_vm7, %v1199_v42, -1e+30  ;;  %v1203_v51 = vsel %vm763_vm10, %v1199_v42, -1e+30  ;;  %vm2773_vm7 = vcmp.eq.s32.totalorder %v2458_v11, %v2358_v44  ;;  %vm2774_vm8 = vmmov %vm2771_vm15 }
 0x33b   : > { %1219 = vmax.xlane.f32.xlu0 %v1202_v53  ;;  %1217 = vmax.xlane.f32.xlu1 %v1201_v43  ;;  %v1161_v54 = vmul.f32 1.442695, %v1160_v58  ;;  %v1204_v57 = vsel %vm2772_vm12, %v1199_v42, -1e+30  ;;  %v1205_v63 = vsel %vm765_vm13, %v1199_v42, -1e+30  ;;  %vm2775_vm10 = vcmp.eq.s32.totalorder %v2473_v13, %v2358_v44 }
 0x33c   : > { %v1206_v0 = vsel %vm766_vm14, %v1199_v42, -1e+30  ;;  %v1207_v4 = vsel %vm767_vm0, %v1199_v42, -1e+30  ;;  %v1208_v3 = vsel %vm768_vm1, %v1199_v42, -1e+30 }
 0x33d   : > { %2056 = vpow2.f32 %v1161_v54  ;;  %v1209_v6 = vsel %vm769_vm4, %v1199_v42, -1e+30  ;;  %v1210_v60 = vsel %vm770_vm3, %v1199_v42, -1e+30  ;;  %v1211_v5 = vsel %vm771_vm6, %v1199_v42, -1e+30 }
 0x33e   : > { %v1212_v7 = vsel %vm2773_vm7, %v1199_v42, -1e+30  ;;  %v1213_v9 = vsel %vm2774_vm8, %v1199_v42, -1e+30  ;;  %v1214_v8 = vsel %vm2775_vm10, %v1199_v42, -1e+30 }
 0x33f   : > { %1221 = vmax.xlane.f32.xlu0 %v1203_v51  ;;  %1191 = vmax.xlane.f32.xlu1 %v1135_v41  ;;  %v1215_v10 = vsel %vm775_vm5, %v1199_v42, -1e+30  ;;  %v1216_v11 = vsel %vm776_vm11, %v1199_v42, -1e+30  ;;  %vm2144_vm13 = vmmov 0  }
 0x340   : > { %1917 = vmatprep.mubr.msk.f32.mxu1 %vm2144_vm13, %v2145_v61 }
 0x343   : > { %1223 = vmax.xlane.f32.xlu0 %v1204_v57  ;;  %1193 = vmax.xlane.f32.xlu1 %v1136_v36 }
 0x347   : > { %1225 = vmax.xlane.f32.xlu0 %v1205_v63  ;;  %v2057_v2 = vpop.eup %2056 }
 0x348   : > { %v2661_v59 = vrot.slane %v2057_v2, %v2639_v52 }
 0x34b   : > { %1227 = vmax.xlane.f32.xlu0 %v1206_v0 }
 0x34f   : > { %1229 = vmax.xlane.f32.xlu0 %v1207_v4 }
 0x353   : > { %1231 = vmax.xlane.f32.xlu0 %v1208_v3 }
 0x357   : > { %1233 = vmax.xlane.f32.xlu0 %v1209_v6 }
 0x35b   : > { %1235 = vmax.xlane.f32.xlu0 %v1210_v60 }
 0x35f   : > { %1237 = vmax.xlane.f32.xlu0 %v1211_v5 }
 0x363   : > { %1239 = vmax.xlane.f32.xlu0 %v1212_v7 }
 0x367   : > { %1241 = vmax.xlane.f32.xlu0 %v1213_v9 }
 0x36b   : > { %1243 = vmax.xlane.f32.xlu0 %v1214_v8 }
 0x36f   : > { %1245 = vmax.xlane.f32.xlu0 %v1215_v10 }
 0x373   : > { %1247 = vmax.xlane.f32.xlu0 %v1216_v11 }
 0x393   : > { %v1166_v44 = vpop.xlane.xlu0 %1165 }
 0x397   : > { %v1164_v31 = vpop.xlane.xlu0 %1163 }
 0x398   : > { %v1170_v12 = vpop.xlane.xlu1 %1169 }
 0x39c   : > { %v1168_v33 = vpop.xlane.xlu1 %1167 }
 0x3a0   : > { %v1174_v13 = vpop.xlane.xlu1 %1173 }
 0x3a4   : > { %v1172_v34 = vpop.xlane.xlu1 %1171 }
 0x3a8   : > { %v1178_v35 = vpop.xlane.xlu1 %1177 }
 0x3ac   : > { %v1176_v40 = vpop.xlane.xlu1 %1175 }
 0x3b0   : > { %v1182_v36 = vpop.xlane.xlu1 %1181 }
 0x3b4   : > { %v1180_v30 = vpop.xlane.xlu1 %1179 }
 0x3b8   : > { %v2695_v41 = vpop.xlane.xlu1 %1185 }
 0x3bc   : > { %v2697_v45 = vpop.xlane.xlu1 %1183 }
 0x3c0   : > { %v2699_v62 = vpop.xlane.xlu1 %1189 }
 0x3c4   : > { %v2701_v38 = vpop.xlane.xlu1 %1187 }
 0x3c8   : > { %v1218_v46 = vpop.xlane.xlu1 %1217  ;;  %v1220_v37 = vpop.xlane.xlu0 %1219 }
 0x3c9   : > { %v1249_v47 = vsub.f32 %v1164_v31, %v1218_v46  ;;  %v1250_v55 = vsub.f32 %v1166_v44, %v1220_v37 }
 0x3cb   : > { %v1265_v39 = vmul.f32 1.442695, %v1249_v47  ;;  %v1267_v48 = vmul.f32 1.442695, %v1250_v55 }
 0x3cc   : > { %v1222_v50 = vpop.xlane.xlu0 %1221 }
 0x3cd   : > { %2058 = vpow2.f32 %v1265_v39  ;;  %v1251_v49 = vsub.f32 %v1168_v33, %v1222_v50 }
 0x3ce   : > { %2060 = vpow2.f32 %v1267_v48 }
 0x3cf   : > { %v1269_v56 = vmul.f32 1.442695, %v1251_v49 }
 0x3d0   : > { %v1224_v1 = vpop.xlane.xlu0 %1223 }
 0x3d1   : > { %v1252_v32 = vsub.f32 %v1170_v12, %v1224_v1  ;;  %2062 = vpow2.f32 %v1269_v56 }
 0x3d3   : > { %v1271_v58 = vmul.f32 1.442695, %v1252_v32 }
 0x3d4   : > { %v1226_v42 = vpop.xlane.xlu0 %1225 }
 0x3d5   : > { %v1253_v53 = vsub.f32 %v1172_v34, %v1226_v42  ;;  %2064 = vpow2.f32 %v1271_v58  ;;  %v1192_v58 = vpop.xlane.xlu1 %1191 }
 0x3d7   : > { %v2059_v43 = vpop.eup %2058  ;;  %v1273_v51 = vmul.f32 1.442695, %v1253_v53 }
 0x3d8   : > { %v1228_v54 = vpop.xlane.xlu0 %1227  ;;  %v1297_v57 = vmul.f32 %v2059_v43, %v2491_v15  ;;  %v2061_v63 = vpop.eup %2060 }
 0x3d9   : > { %v1254_v0 = vsub.f32 %v1174_v13, %v1228_v54  ;;  %2066 = vpow2.f32 %v1273_v51  ;;  %v1298_v3 = vmul.f32 %v2061_v63, %v2488_v14  ;;  %v1194_v51 = vpop.xlane.xlu1 %1193 }
 0x3da   : > { %1345 = vxpose.xlu1.b32.start [1/16] (narrow) %v1297_v57, 24 }
 0x3db   : > { %v1275_v2 = vmul.f32 1.442695, %v1254_v0  ;;  %v2063_v6 = vpop.eup %2062 }
 0x3dc   : > { %v1230_v4 = vpop.xlane.xlu0 %1229  ;;  %v1299_v9 = vmul.f32 %v2063_v6, %v2496_v17 }
 0x3dd   : > { %v1255_v60 = vsub.f32 %v1176_v40, %v1230_v4  ;;  %2068 = vpow2.f32 %v1275_v2 }
 0x3de   : > { %1346 = vxpose.xlu1.b32.cont [2/16] (narrow) %v1298_v3, 24 }
 0x3df   : > { %v1277_v5 = vmul.f32 1.442695, %v1255_v60  ;;  %v2065_v8 = vpop.eup %2064 }
 0x3e0   : > { %v1232_v7 = vpop.xlane.xlu0 %1231  ;;  %v1300_v12 = vmul.f32 %v2065_v8, %v2494_v16  ;;  %v1458_v8 = vld [vmem:[#allocation4 + $0x8] sm:$0xff] }
 0x3e1   : > { %v1256_v10 = vsub.f32 %v1178_v35, %v1232_v7  ;;  %2070 = vpow2.f32 %v1277_v5 }
 0x3e2   : > { %1347 = vxpose.xlu1.b32.cont [3/16] (narrow) %v1299_v9, 24 }
 0x3e3   : > { %v1279_v15 = vmul.f32 1.442695, %v1256_v10  ;;  %v2067_v33 = vpop.eup %2066 }
 0x3e4   : > { %v1234_v11 = vpop.xlane.xlu0 %1233  ;;  %v1301_v40 = vmul.f32 %v2067_v33, %v2502_v19 }
 0x3e5   : > { %v1257_v13 = vsub.f32 %v1180_v30, %v1234_v11  ;;  %2072 = vpow2.f32 %v1279_v15  ;;  %v1467_v15 = vmul.f32 %v2661_v59, %v1458_v8 }
 0x3e6   : > { %1348 = vxpose.xlu1.b32.cont [4/16] (narrow) %v1300_v12, 24  ;;  %v1459_v12 = vld [vmem:[#allocation4 + $0x10] sm:$0x3] }
 0x3e7   : > { %v1281_v14 = vmul.f32 1.442695, %v1257_v13  ;;  %v2069_v44 = vpop.eup %2068 }
 0x3e8   : > { %v1236_v34 = vpop.xlane.xlu0 %1235  ;;  %v1302_v46 = vmul.f32 %v2069_v44, %v2500_v18 }
 0x3e9   : > { %v1258_v31 = vsub.f32 %v1182_v36, %v1236_v34  ;;  %2074 = vpow2.f32 %v1281_v14  ;;  %v1468_v14 = vmul.f32 %v2661_v59, %v1459_v12 }
 0x3ea   : > { %1349 = vxpose.xlu1.b32.cont [5/16] (narrow) %v1301_v40, 24 }
 0x3eb   : > { %v1283_v17 = vmul.f32 1.442695, %v1258_v31  ;;  %v2071_v37 = vpop.eup %2070 }
 0x3ec   : > { %v1238_v35 = vpop.xlane.xlu0 %1237  ;;  %v1303_v55 = vmul.f32 %v2071_v37, %v2508_v21 }
 0x3ed   : > { %v1259_v47 = vsub.f32 %v2697_v45, %v1238_v35  ;;  %2076 = vpow2.f32 %v1283_v17 }
 0x3ee   : > { %1350 = vxpose.xlu1.b32.cont [6/16] (narrow) %v1302_v46, 24 }
 0x3ef   : > { %v1285_v16 = vmul.f32 1.442695, %v1259_v47  ;;  %v2073_v39 = vpop.eup %2072 }
 0x3f0   : > { %v1240_v30 = vpop.xlane.xlu0 %1239  ;;  %v1304_v50 = vmul.f32 %v2073_v39, %v2506_v20 }
 0x3f1   : > { %v1260_v19 = vsub.f32 %v2695_v41, %v1240_v30  ;;  %2078 = vpow2.f32 %v1285_v16 }
 0x3f2   : > { %1351 = vxpose.xlu1.b32.cont [7/16] (narrow) %v1303_v55, 24 }
 0x3f3   : > { %v1287_v36 = vmul.f32 1.442695, %v1260_v19  ;;  %v2075_v49 = vpop.eup %2074 }
 0x3f4   : > { %v1242_v48 = vpop.xlane.xlu0 %1241  ;;  %v1305_v1 = vmul.f32 %v2075_v49, %v2514_v23 }
 0x3f5   : > { %v1261_v18 = vsub.f32 %v2701_v38, %v1242_v48  ;;  %2080 = vpow2.f32 %v1287_v36 }
 0x3f6   : > { %1352 = vxpose.xlu1.b32.cont [8/16] (narrow) %v1304_v50, 24 }
 0x3f7   : > { %v1289_v45 = vmul.f32 1.442695, %v1261_v18  ;;  %v2077_v32 = vpop.eup %2076 }
 0x3f8   : > { %v1244_v56 = vpop.xlane.xlu0 %1243  ;;  %v1306_v53 = vmul.f32 %v2077_v32, %v2512_v22 }
 0x3f9   : > { %v1262_v21 = vsub.f32 %v2699_v62, %v1244_v56  ;;  %2082 = vpow2.f32 %v1289_v45 }
 0x3fa   : > { %1353 = vxpose.xlu1.b32.cont [9/16] (narrow) %v1305_v1, 24 }
 0x3fb   : > { %v1291_v41 = vmul.f32 1.442695, %v1262_v21  ;;  %v2079_v20 = vpop.eup %2078 }
 0x3fc   : > { %v1246_v42 = vpop.xlane.xlu0 %1245  ;;  %v1307_v57 = vmul.f32 %v2079_v20, %v2520_v25 }
 0x3fd   : > { %v1263_v43 = vsub.f32 %v1192_v58, %v1246_v42  ;;  %2084 = vpow2.f32 %v1291_v41 }
 0x3fe   : > { %1354 = vxpose.xlu1.b32.cont [10/16] (narrow) %v1306_v53, 24 }
 0x3ff   : > { %v1293_v38 = vmul.f32 1.442695, %v1263_v43  ;;  %v2081_v23 = vpop.eup %2080 }
 0x400   : > { %v1248_v54 = vpop.xlane.xlu0 %1247  ;;  %v1308_v0 = vmul.f32 %v2081_v23, %v2518_v24 }
 0x401   : > { %v1264_v63 = vsub.f32 %v1194_v51, %v1248_v54  ;;  %2086 = vpow2.f32 %v1293_v38 }
 0x402   : > { %1355 = vxpose.xlu1.b32.cont [11/16] (narrow) %v1307_v57, 24 }
 0x403   : > { %v1295_v62 = vmul.f32 1.442695, %v1264_v63  ;;  %v2083_v2 = vpop.eup %2082 }
 0x404   : > { %v1309_v22 = vmul.f32 %v2083_v2, %v2526_v27  ;;  %v1457_v27 = vld [vmem:[#allocation4] sm:$0xff] }
 0x405   : > { %2088 = vpow2.f32 %v1295_v62 }
 0x406   : > { %1356 = vxpose.xlu1.b32.cont [12/16] (narrow) %v1308_v0, 24 }
 0x407   : > { %v2085_v4 = vpop.eup %2084 }
 0x408   : > { %v1310_v3 = vmul.f32 %v2085_v4, %v2524_v26 }
 0x40a   : > { %1357 = vxpose.xlu1.b32.cont [13/16] (narrow) %v1309_v22, 24 }
 0x40b   : > { %v2087_v6 = vpop.eup %2086 }
 0x40c   : > { %v1311_v25 = vmul.f32 %v2087_v6, %v2532_v29  ;;  %v1466_v29 = vmul.f32 %v2661_v59, %v1457_v27 }
 0x40e   : > { %1358 = vxpose.xlu1.b32.cont [14/16] (narrow) %v1310_v3, 24 }
 0x40f   : > { %v2089_v60 = vpop.eup %2088 }
 0x410   : > { %v1312_v5 = vmul.f32 %v2089_v60, %v2530_v28 }
 0x412   : > { %1359 = vxpose.xlu1.b32.cont [15/16] (narrow) %v1311_v25, 24 }
 0x416   : > { %1360 = vxpose.xlu1.b32.end [16/16] (narrow) %v1312_v5, 24 }
 0x45a   : > { %v1361_v7 = vpop.trf.xlu1 }
 0x45b   : > { %1918 = vmatmul.mubr.f32.vlgmr.msra.gmra.mrb[0].mxu1 %v1361_v7 }
 0x45c   : > { %1920 = vmatprep.mubr.msk.f32.mxu1 %vm2144_vm13, %v2145_v61 }
 0x45e   : > { %v1362_v24 = vpop.trf.xlu1 }
 0x45f   : > { %1921 = vmatmul.mubr.f32.gmra.mrb[2].mxu1 %v1362_v24 }
 0x460   : > { %1923 = vmatprep.mubr.msk.f32.mxu1 %vm2144_vm13, %v2145_v61 }
 0x462   : > { %v1363_v26 = vpop.trf.xlu1 }
 0x463   : > { %1924 = vmatmul.mubr.f32.gmra.mrb[4].mxu1 %v1363_v26 }
 0x52e   : > { %v1443_v9 = vpop.f32.mrb[0].mxu1 }
 0x52f   : > { %v1469_v10 = vadd.f32 %v1466_v29, %v1443_v9  ;;  %v1919_v28 = vpop.f32.mrb[1].mxu1 }
 0x531   : > { %1472 = vst [vmem:[#allocation4] sm:$0xff] %v1469_v10 }
 0x532   : > { %v1448_v11 = vpop.f32.mrb[2].mxu1 }
 0x533   : > { %v1470_v33 = vadd.f32 %v1467_v15, %v1448_v11  ;;  %v1922_v13 = vpop.f32.mrb[3].mxu1  ;;  %1479 = sbr.rel (%p1673_p5) target bundleno = 1382 (0x566), region = 48 }
 0x535   : > { %1473 = vst [vmem:[#allocation4 + $0x8] sm:$0xff] %v1470_v33 }
 0x536   : > { %v1453_v61 = vpop.f32.mrb[4].mxu1 }
 0x537   : > { %v1471_v34 = vadd.f32 %v1468_v14, %v1453_v61  ;;  %v1925_v40 = vpop.f32.mrb[5].mxu1 }
 0x538   : > { %v1482_v35 = vld [vmem:[#allocation4] sm:$0xff] (!%p1673_p5) }
 0x539   : > { %1474 = vst [vmem:[#allocation4 + $0x10] sm:$0x3] %v1471_v34 }
 0x53c   : > { %v1483_v46 = vld [vmem:[#allocation4 + $0x8] sm:$0xff] }
 0x540   : > { %v1480_v44 = vld [vmem:[#allocation4 + $0x11] sm:$0x1] }
 0x541   : > { %v1481_v31 = vadd.f32 1e-16, %v1480_v44 }
 0x543   : > { %v1487_v17 = vrot.slane %v1481_v31, %v2639_v52 }
 0x545   : > { %2090 = vrcp.f32 %v1487_v17 }
 0x54f   : > { %v2091_v37 = vpop.eup %2090 }
 0x550   : > { %v1489_v47 = vmul.f32 %v2091_v37, %v1482_v35  ;;  %v1490_v16 = vmul.f32 %v2091_v37, %v1483_v46 }
 0x552   : > { %v1493_v30 = vmin.f32 %v1489_v47, 0.0  ;;  %v1494_v55 = vmin.f32 %v1490_v16, 0.0  ;;  %vm1491_vm14 = vcmp.gt.f32.partialorder %v1489_v47, 0.0  ;;  %vm1492_vm0 = vcmp.gt.f32.partialorder %v1490_v16, 0.0 }
 0x554   : > { %v1495_v59 = vmul.f32 1.442695, %v1493_v30  ;;  %v1497_v39 = vmul.f32 1.442695, %v1494_v55 }
 0x556   : > { %2092 = vpow2.f32 %v1495_v59 }
 0x557   : > { %2094 = vpow2.f32 %v1497_v39 }
 0x560   : > { %v2093_v19 = vpop.eup %2092 }
 0x561   : > { %v2095_v36 = vpop.eup %2094  ;;  %v1674_v48 = vadd.f32 -1.0, %v2093_v19 }
 0x562   : > { %v1675_v50 = vadd.f32 -1.0, %v2095_v36 }
 0x563   : > { %v1501_v49 = vsel %vm1491_vm14, %v1489_v47, %v1674_v48 }
 0x564   : > { %1503 = vst [vmem:[#allocation6] sm:$0xff] %v1501_v49  ;;  %v1502_v52 = vsel %vm1492_vm0, %v1490_v16, %v1675_v50 }
 0x565   : > { %1504 = vst [vmem:[#allocation6 + $0x8] sm:$0xff] %v1502_v52 }
 0x566 PF: > { %p2024_p6 = scmp.eq.s32.totalorder %s2185_s19, 1  ;;  %s2146_s24 = smov [#allocation6]  }
 0x567   : > { %s1511_s27 = sshll.u32 %s2146_s24, 4  ;;  %s1512_s27 = int_to_ptr.vmem [resolvable:$true] %s1511_s27 }
 0x568   : > { %s2096_s22 = scalar_lea.vmem %s1512_s27, 256  ;;  %p2103_p10 = scmp.lt.s32.totalorder %s1512_s27, %s1512_s27 }
 0x569   : > { %p2097_p7 = scmp.ne.s32.totalorder %s1512_s27, %s2096_s22  ;;  %p2104_p11 = scmp.lt.s32.totalorder %s2096_s22, %s2096_s22 }
 0x56b   : > { %p2098_p8 = pnand %p2097_p7, %p2024_p6  ;;  %p2105_p12 = por %p2104_p11, %p2103_p10 }
 0x56d   : > { %p2099_p9 = pneg %p2098_p8 }
 0x56f   : > { %p2106_p13 = pnand %p2105_p12, %p2099_p9 }
 0x571   : > { %2109 = shalt.err (!%p2106_p13)
}
 0x572   : > { %s2110_s26 = scalar_lea.hbm %s2763_s5, 256 }
 0x573   : > { %p2111_p0 = scmp.ne.s32.totalorder %s2763_s5, %s2110_s26  ;;  %p2116_p3 = scmp.lt.u32.totalorder %s2110_s26, %s2763_s5 }
 0x575   : > { %p2112_p1 = pnand %p2111_p0, %p2024_p6 }
 0x577   : > { %p2113_p2 = pneg %p2112_p1 }
 0x579   : > { %p2118_p4 = pnand %p2116_p3, %p2113_p2 }
 0x57b   : > { %2121 = shalt.err (!%p2118_p4)
}
 0x57c   : > { %s2147_s7 = smov 128   ;;  %s2148_s8 = smov 8  }
 0x57d   : > { %2021 = dma.vmem_to_hbm [thread:$0]  (%p2024_p6), %s1512_s27, 256, %s2763_s5, [#allocation7], %s2147_s7, %s2147_s7, %s2148_s8  }
 0x57e   : > { %2127 = dma.done.wait (%p2024_p6), [#allocation7], 256  }
 0x57f   : > { %2129 = vsyncadd (%p2024_p6), [#allocation7], 4294967040 }
 0x580 PF: > { %s16_s18 = sadd.s32 1, %s2132_s18  }
 0x581   : > { %p13_p5 = scmp.ge.s32.totalorder %s16_s18, 4  }
 0x583   :  { %15 = sbr.rel (!%p13_p5) target bundleno = 1 (0x1), region = 78 }
 0x58a   :  { %1527 = vsyncpa [#allocation7], 1 }
 0x58b   :  { %1529 = vsyncpa [#allocation7 + $0x1], 1 }

</bundles_post_ra>
